<compile_context>
chip_gen: v7x
topology: tpu7x:2x2x1
jax: 0.10.0
libtpu: 0.0.40
codegen_flags: <defaults>
</compile_context>

<pallas_src>
import numpy as np
import jax
import jax.numpy as jnp
from jax.experimental import pallas as pl
from jax.experimental.pallas import tpu as pltpu


def _interp_matrix(n_in, n_out):
    """(n_out, n_in) matrix for 1-D bilinear interpolation, align_corners=True."""
    src = np.arange(n_out, dtype=np.float64) * (n_in - 1) / (n_out - 1)
    lo = np.clip(np.floor(src).astype(np.int64), 0, n_in - 1)
    hi = np.minimum(lo + 1, n_in - 1)
    frac = src - lo
    m = np.zeros((n_out, n_in), dtype=np.float32)
    m[np.arange(n_out), lo] += (1.0 - frac).astype(np.float32)
    m[np.arange(n_out), hi] += frac.astype(np.float32)
    return m


def upsample_layer_forward(x, conv_w, conv_b, gamma, beta, eps=1e-5):
    # conv_b is accepted for interface parity but intentionally unused: a per-channel
    # constant bias is cancelled exactly by the training-mode BatchNorm mean subtraction.
    del conv_b
    N, Cin, H, W = x.shape
    Cout = conv_w.shape[0]
    Hout, Wout = 2 * H, 2 * W
    R, C = Cout * Hout, N * Wout          # kernel-output rows / cols
    K1, K2 = Cin * H, N * W               # contraction dims of the two matmul stages

    # ---------------- host-side constants (all tiny) --------------------------
    # Zero-padded 1-D interpolation operators (zero border supplies the conv padding=1).
    uh_pad = np.zeros((Hout + 2, H), np.float32)
    uh_pad[1:-1, :] = _interp_matrix(H, Hout)
    uw_pad = np.zeros((Wout + 2, W), np.float32)
    uw_pad[1:-1, :] = _interp_matrix(W, Wout)

    w_np = np.asarray(conv_w, np.float32)                      # (Cout, Cin, 3, 3)
    lw = np.zeros((3, R, K1), np.float32)                      # per-kx left operator
    for kx in range(3):
        for ky in range(3):
            lw[kx] += np.kron(w_np[:, :, ky, kx], uh_pad[ky:ky + Hout, :])
    rw = np.zeros((3, K2, C), np.float32)                      # per-kx right operator
    for kx in range(3):
        rw[kx] = np.kron(np.eye(N, dtype=np.float32), uw_pad[kx:kx + Wout, :].T)

    # 0/1 indicator used for per-channel (co) group sums / broadcasts over (co,ho) rows.
    s8 = np.kron(np.eye(Cout, dtype=np.float32), np.ones((1, Hout), np.float32))

    lw_j = jnp.asarray(lw, jnp.bfloat16)
    rw_j = jnp.asarray(rw, jnp.bfloat16)
    s8_j = jnp.asarray(s8, jnp.float32)                        # (Cout, R)
    s8t_j = jnp.asarray(s8.T, jnp.float32)                     # (R, Cout)
    g2 = jnp.asarray(gamma, jnp.float32).reshape(Cout, 1)
    be2 = jnp.asarray(beta, jnp.float32).reshape(Cout, 1)

    # x_f[(ci*H + h), (n*W + w)] = x[n, ci, h, w]   (host-side layout prep, tiny)
    x_f = jnp.transpose(jnp.asarray(x, jnp.float32), (1, 2, 0, 3)).reshape(K1, K2)
    x_f = x_f.astype(jnp.bfloat16)

    inv_count = 1.0 / float(N * Hout * Wout)

    # ------------- single fused kernel: upsample + conv + BN + ReLU -----------
    def fused_kernel(x_ref, lw_ref, rw_ref, s8_ref, s8t_ref, g_ref, b_ref, out_ref):
        xb = x_ref[...]                                         # (Cin*H, N*W) bf16
        # Upsample + zero-pad + 3x3 conv as 3+3 MXU matmuls over the whole batch.
        conv = None
        for kx in range(3):                                     # static unroll
            p = jnp.dot(lw_ref[kx], xb,
                        preferred_element_type=jnp.float32)     # (R, N*W)
            t = jnp.dot(p.astype(jnp.bfloat16), rw_ref[kx],
                        preferred_element_type=jnp.float32)     # (R, C)
            conv = t if conv is None else conv + t
        # conv[(co*Hout+ho), (n*Wout+wo)]; conv bias omitted (cancelled by BN mean).

        # BatchNorm2d with training batch statistics (two-pass) + ReLU.
        s8m = s8_ref[...]                                       # (Cout, R)
        s8t = s8t_ref[...]                                      # (R, Cout)
        sums = jnp.dot(s8m, conv, preferred_element_type=jnp.float32)      # (Cout, C)
        mean = jnp.sum(sums, axis=1, keepdims=True) * inv_count            # (Cout, 1)
        mean_full = jnp.dot(s8t, jnp.broadcast_to(mean, (Cout, C)),
                            preferred_element_type=jnp.float32)            # (R, C)
        d = conv - mean_full
        sq = jnp.dot(s8m, d * d, preferred_element_type=jnp.float32)       # (Cout, C)
        var = jnp.sum(sq, axis=1, keepdims=True) * inv_count               # (Cout, 1)
        scale = g_ref[...] * jax.lax.rsqrt(var + eps)                      # (Cout, 1)
        scale_full = jnp.dot(s8t, jnp.broadcast_to(scale, (Cout, C)),
                             preferred_element_type=jnp.float32)           # (R, C)
        shift_full = jnp.dot(s8t, jnp.broadcast_to(b_ref[...], (Cout, C)),
                             preferred_element_type=jnp.float32)           # (R, C)
        out_ref[...] = jnp.maximum(d * scale_full + shift_full, 0.0)

    out_flat = pl.pallas_call(
        fused_kernel,
        grid=(1,),
        in_specs=[
            pl.BlockSpec((K1, K2), lambda i: (0, 0)),           # x
            pl.BlockSpec((3, R, K1), lambda i: (0, 0, 0)),      # LW (bf16)
            pl.BlockSpec((3, K2, C), lambda i: (0, 0, 0)),      # RW (bf16)
            pl.BlockSpec((Cout, R), lambda i: (0, 0)),          # channel indicator
            pl.BlockSpec((R, Cout), lambda i: (0, 0)),          # its transpose
            pl.BlockSpec((Cout, 1), lambda i: (0, 0)),          # gamma
            pl.BlockSpec((Cout, 1), lambda i: (0, 0)),          # beta
        ],
        out_specs=pl.BlockSpec((R, C), lambda i: (0, 0)),
        out_shape=jax.ShapeDtypeStruct((R, C), jnp.float32),
        compiler_params=pltpu.CompilerParams(
            dimension_semantics=("arbitrary",),                 # single step, single TC
            vmem_limit_bytes=16 * 1024 * 1024,                  # modest; fits v5e/v6e/v7x
        ),
    )(x_f, lw_j, rw_j, s8_j, s8t_j, g2, be2)

    # (Cout*Hout, N*Wout) -> (N, Cout, Hout, Wout)  (cheap wrapper-side reshape)
    return out_flat.reshape(Cout, Hout, N, Wout).transpose(2, 0, 1, 3)


# ------------------------- pure-JAX reference for checking -------------------
def reference_forward(x, conv_w, conv_b, gamma, beta, eps=1e-5):
    N, C, H, W = x.shape
    Ho, Wo = 2 * H, 2 * W
    sh = jnp.arange(Ho, dtype=jnp.float32) * (H - 1) / (Ho - 1)
    sw = jnp.arange(Wo, dtype=jnp.float32) * (W - 1) / (Wo - 1)
    h0 = jnp.clip(jnp.floor(sh).astype(jnp.int32), 0, H - 1)
    h1 = jnp.minimum(h0 + 1, H - 1)
    fh = sh - h0.astype(jnp.float32)
    w0 = jnp.clip(jnp.floor(sw).astype(jnp.int32), 0, W - 1)
    w1 = jnp.minimum(w0 + 1, W - 1)
    fw = sw - w0.astype(jnp.float32)
    xh0 = jnp.take(x, h0, axis=2)
    xh1 = jnp.take(x, h1, axis=2)
    top = xh0 * (1 - fh)[None, None, :, None] + xh1 * fh[None, None, :, None]
    tw0 = jnp.take(top, w0, axis=3)
    tw1 = jnp.take(top, w1, axis=3)
    up = tw0 * (1 - fw)[None, None, None, :] + tw1 * fw[None, None, None, :]
    con = jax.lax.conv_general_dilated(
        up, conv_w, (1, 1), "SAME",
        dimension_numbers=("NCHW", "OIHW", "NCHW"),
        precision=jax.lax.Precision.HIGHEST) + conv_b[None, :, None, None]
    mean = con.mean(axis=(0, 2, 3))
    var = ((con - mean[None, :, None, None]) ** 2).mean(axis=(0, 2, 3))
    bn = (gamma[None, :, None, None] * (con - mean[None, :, None, None])
          / jnp.sqrt(var + eps)[None, :, None, None] + beta[None, :, None, None])
    return jnp.maximum(bn, 0.0)


if __name__ == "__main__":
    key = jax.random.PRNGKey(0)
    kx_, kw, kb, kg, kbe = jax.random.split(key, 5)

    # filter = [4, 8]  ->  Cin=4, Cout=8
    N, Cin, H, W = 2, 4, 16, 16
    Cout = 8

    x = jax.random.normal(kx_, (N, Cin, H, W), dtype=jnp.float32)
    conv_w = 0.1 * jax.random.normal(kw, (Cout, Cin, 3, 3), dtype=jnp.float32)
    conv_b = 0.1 * jax.random.normal(kb, (Cout,), dtype=jnp.float32)
    gamma = 1.0 + 0.1 * jax.random.normal(kg, (Cout,), dtype=jnp.float32)
    beta = 0.1 * jax.random.normal(kbe, (Cout,), dtype=jnp.float32)

    out = upsample_layer_forward(x, conv_w, conv_b, gamma, beta)
    out = jax.block_until_ready(out)

    ref = jax.block_until_ready(reference_forward(x, conv_w, conv_b, gamma, beta))

    assert out.shape == (N, Cout, 2 * H, 2 * W), out.shape
    if not jnp.allclose(out, ref, atol=5e-2, rtol=5e-2):
        raise AssertionError(
            f"mismatch vs reference, max abs err = {float(jnp.max(jnp.abs(out - ref)))}")
    print("KERNEL_OK")
</pallas_src>

<mosaic_0001>
module attributes {stable_mosaic.version = 11 : i64} {
  func.func @fused_kernel(%arg0: i32, %arg1: memref<64x32xbf16, #tpu.memory_space<vmem>>, %arg2: memref<3x256x64xbf16, #tpu.memory_space<vmem>>, %arg3: memref<3x32x64xbf16, #tpu.memory_space<vmem>>, %arg4: memref<8x256xf32, #tpu.memory_space<vmem>>, %arg5: memref<256x8xf32, #tpu.memory_space<vmem>>, %arg6: memref<8x1xf32, #tpu.memory_space<vmem>>, %arg7: memref<8x1xf32, #tpu.memory_space<vmem>>, %arg8: memref<256x64xf32, #tpu.memory_space<vmem>>) attributes {dimension_semantics = [#tpu.dimension_semantics<arbitrary>], iteration_bounds = array<i64: 1>, scalar_prefetch = 0 : i64, scratch_operands = 0 : i64, tpu.core_type = #tpu.core_type<tc>, window_params = [{pipeline_mode = #tpu.pipeline_mode<synchronous>, transform_indices = @transform_0, window_bounds = array<i64: 64, 32>}, {pipeline_mode = #tpu.pipeline_mode<synchronous>, transform_indices = @transform_1, window_bounds = array<i64: 3, 256, 64>}, {pipeline_mode = #tpu.pipeline_mode<synchronous>, transform_indices = @transform_2, window_bounds = array<i64: 3, 32, 64>}, {pipeline_mode = #tpu.pipeline_mode<synchronous>, transform_indices = @transform_3, window_bounds = array<i64: 8, 256>}, {pipeline_mode = #tpu.pipeline_mode<synchronous>, transform_indices = @transform_4, window_bounds = array<i64: 256, 8>}, {pipeline_mode = #tpu.pipeline_mode<synchronous>, transform_indices = @transform_5, window_bounds = array<i64: 8, 1>}, {pipeline_mode = #tpu.pipeline_mode<synchronous>, transform_indices = @transform_6, window_bounds = array<i64: 8, 1>}, {pipeline_mode = #tpu.pipeline_mode<synchronous>, transform_indices = @transform_7, window_bounds = array<i64: 256, 64>}]} {
    %c0 = arith.constant 0 : index
    %c0_0 = arith.constant 0 : index
    %0 = vector.load %arg1[%c0, %c0_0] : memref<64x32xbf16, #tpu.memory_space<vmem>>, vector<64x32xbf16>
    %c0_1 = arith.constant 0 : index
    %c0_2 = arith.constant 0 : index
    %c0_3 = arith.constant 0 : index
    %1 = vector.load %arg2[%c0_1, %c0_2, %c0_3] : memref<3x256x64xbf16, #tpu.memory_space<vmem>>, vector<1x256x64xbf16>
    %2 = vector.shape_cast %1 : vector<1x256x64xbf16> to vector<256x64xbf16>
    %cst = arith.constant dense<0.000000e+00> : vector<256x32xf32>
    %3 = tpu.matmul %2, %0, %cst {dimension_numbers = #tpu.dot_dimension_numbers<[1], [0], [0], [1], [0, 0, 1, 1], [], []>} : vector<256x64xbf16>, vector<64x32xbf16>, vector<256x32xf32> -> vector<256x32xf32>
    %4 = arith.truncf %3 : vector<256x32xf32> to vector<256x32xbf16>
    %c0_4 = arith.constant 0 : index
    %c0_5 = arith.constant 0 : index
    %c0_6 = arith.constant 0 : index
    %5 = vector.load %arg3[%c0_4, %c0_5, %c0_6] : memref<3x32x64xbf16, #tpu.memory_space<vmem>>, vector<1x32x64xbf16>
    %6 = vector.shape_cast %5 : vector<1x32x64xbf16> to vector<32x64xbf16>
    %cst_7 = arith.constant dense<0.000000e+00> : vector<256x64xf32>
    %7 = tpu.matmul %4, %6, %cst_7 {dimension_numbers = #tpu.dot_dimension_numbers<[1], [0], [0], [1], [0, 0, 1, 1], [], []>} : vector<256x32xbf16>, vector<32x64xbf16>, vector<256x64xf32> -> vector<256x64xf32>
    %c1 = arith.constant 1 : index
    %c0_8 = arith.constant 0 : index
    %c0_9 = arith.constant 0 : index
    %8 = vector.load %arg2[%c1, %c0_8, %c0_9] : memref<3x256x64xbf16, #tpu.memory_space<vmem>>, vector<1x256x64xbf16>
    %9 = vector.shape_cast %8 : vector<1x256x64xbf16> to vector<256x64xbf16>
    %cst_10 = arith.constant dense<0.000000e+00> : vector<256x32xf32>
    %10 = tpu.matmul %9, %0, %cst_10 {dimension_numbers = #tpu.dot_dimension_numbers<[1], [0], [0], [1], [0, 0, 1, 1], [], []>} : vector<256x64xbf16>, vector<64x32xbf16>, vector<256x32xf32> -> vector<256x32xf32>
    %11 = arith.truncf %10 : vector<256x32xf32> to vector<256x32xbf16>
    %c1_11 = arith.constant 1 : index
    %c0_12 = arith.constant 0 : index
    %c0_13 = arith.constant 0 : index
    %12 = vector.load %arg3[%c1_11, %c0_12, %c0_13] : memref<3x32x64xbf16, #tpu.memory_space<vmem>>, vector<1x32x64xbf16>
    %13 = vector.shape_cast %12 : vector<1x32x64xbf16> to vector<32x64xbf16>
    %cst_14 = arith.constant dense<0.000000e+00> : vector<256x64xf32>
    %14 = tpu.matmul %11, %13, %cst_14 {dimension_numbers = #tpu.dot_dimension_numbers<[1], [0], [0], [1], [0, 0, 1, 1], [], []>} : vector<256x32xbf16>, vector<32x64xbf16>, vector<256x64xf32> -> vector<256x64xf32>
    %15 = arith.addf %7, %14 : vector<256x64xf32>
    %c2 = arith.constant 2 : index
    %c0_15 = arith.constant 0 : index
    %c0_16 = arith.constant 0 : index
    %16 = vector.load %arg2[%c2, %c0_15, %c0_16] : memref<3x256x64xbf16, #tpu.memory_space<vmem>>, vector<1x256x64xbf16>
    %17 = vector.shape_cast %16 : vector<1x256x64xbf16> to vector<256x64xbf16>
    %cst_17 = arith.constant dense<0.000000e+00> : vector<256x32xf32>
    %18 = tpu.matmul %17, %0, %cst_17 {dimension_numbers = #tpu.dot_dimension_numbers<[1], [0], [0], [1], [0, 0, 1, 1], [], []>} : vector<256x64xbf16>, vector<64x32xbf16>, vector<256x32xf32> -> vector<256x32xf32>
    %19 = arith.truncf %18 : vector<256x32xf32> to vector<256x32xbf16>
    %c2_18 = arith.constant 2 : index
    %c0_19 = arith.constant 0 : index
    %c0_20 = arith.constant 0 : index
    %20 = vector.load %arg3[%c2_18, %c0_19, %c0_20] : memref<3x32x64xbf16, #tpu.memory_space<vmem>>, vector<1x32x64xbf16>
    %21 = vector.shape_cast %20 : vector<1x32x64xbf16> to vector<32x64xbf16>
    %cst_21 = arith.constant dense<0.000000e+00> : vector<256x64xf32>
    %22 = tpu.matmul %19, %21, %cst_21 {dimension_numbers = #tpu.dot_dimension_numbers<[1], [0], [0], [1], [0, 0, 1, 1], [], []>} : vector<256x32xbf16>, vector<32x64xbf16>, vector<256x64xf32> -> vector<256x64xf32>
    %23 = arith.addf %15, %22 : vector<256x64xf32>
    %c0_22 = arith.constant 0 : index
    %c0_23 = arith.constant 0 : index
    %24 = vector.load %arg4[%c0_22, %c0_23] : memref<8x256xf32, #tpu.memory_space<vmem>>, vector<8x256xf32>
    %c0_24 = arith.constant 0 : index
    %c0_25 = arith.constant 0 : index
    %25 = vector.load %arg5[%c0_24, %c0_25] : memref<256x8xf32, #tpu.memory_space<vmem>>, vector<256x8xf32>
    %cst_26 = arith.constant dense<0.000000e+00> : vector<8x64xf32>
    %26 = tpu.matmul %24, %23, %cst_26 {dimension_numbers = #tpu.dot_dimension_numbers<[1], [0], [0], [1], [0, 0, 1, 1], [], []>} : vector<8x256xf32>, vector<256x64xf32>, vector<8x64xf32> -> vector<8x64xf32>
    %cst_27 = arith.constant dense<0.000000e+00> : vector<8xf32>
    %27 = vector.multi_reduction <add>, %26, %cst_27 [1] : vector<8x64xf32> to vector<8xf32>
    %28 = vector.shape_cast %27 : vector<8xf32> to vector<8x1xf32>
    %cst_28 = arith.constant 4.8828125E-4 : f32
    %29 = vector.broadcast %cst_28 : f32 to vector<8x1xf32>
    %30 = arith.mulf %28, %29 : vector<8x1xf32>
    %31 = vector.shape_cast %30 : vector<8x1xf32> to vector<8x1xf32>
    %32 = vector.broadcast %31 : vector<8x1xf32> to vector<8x64xf32>
    %cst_29 = arith.constant dense<0.000000e+00> : vector<256x64xf32>
    %33 = tpu.matmul %25, %32, %cst_29 {dimension_numbers = #tpu.dot_dimension_numbers<[1], [0], [0], [1], [0, 0, 1, 1], [], []>} : vector<256x8xf32>, vector<8x64xf32>, vector<256x64xf32> -> vector<256x64xf32>
    %34 = arith.subf %23, %33 : vector<256x64xf32>
    %35 = arith.mulf %34, %34 : vector<256x64xf32>
    %cst_30 = arith.constant dense<0.000000e+00> : vector<8x64xf32>
    %36 = tpu.matmul %24, %35, %cst_30 {dimension_numbers = #tpu.dot_dimension_numbers<[1], [0], [0], [1], [0, 0, 1, 1], [], []>} : vector<8x256xf32>, vector<256x64xf32>, vector<8x64xf32> -> vector<8x64xf32>
    %cst_31 = arith.constant dense<0.000000e+00> : vector<8xf32>
    %37 = vector.multi_reduction <add>, %36, %cst_31 [1] : vector<8x64xf32> to vector<8xf32>
    %38 = vector.shape_cast %37 : vector<8xf32> to vector<8x1xf32>
    %cst_32 = arith.constant 4.8828125E-4 : f32
    %39 = vector.broadcast %cst_32 : f32 to vector<8x1xf32>
    %40 = arith.mulf %38, %39 : vector<8x1xf32>
    %c0_33 = arith.constant 0 : index
    %c0_34 = arith.constant 0 : index
    %41 = vector.load %arg6[%c0_33, %c0_34] : memref<8x1xf32, #tpu.memory_space<vmem>>, vector<8x1xf32>
    %cst_35 = arith.constant 9.99999974E-6 : f32
    %42 = vector.broadcast %cst_35 : f32 to vector<8x1xf32>
    %43 = arith.addf %40, %42 : vector<8x1xf32>
    %44 = math.rsqrt %43 : vector<8x1xf32>
    %45 = arith.mulf %41, %44 : vector<8x1xf32>
    %46 = vector.shape_cast %45 : vector<8x1xf32> to vector<8x1xf32>
    %47 = vector.broadcast %46 : vector<8x1xf32> to vector<8x64xf32>
    %cst_36 = arith.constant dense<0.000000e+00> : vector<256x64xf32>
    %48 = tpu.matmul %25, %47, %cst_36 {dimension_numbers = #tpu.dot_dimension_numbers<[1], [0], [0], [1], [0, 0, 1, 1], [], []>} : vector<256x8xf32>, vector<8x64xf32>, vector<256x64xf32> -> vector<256x64xf32>
    %c0_37 = arith.constant 0 : index
    %c0_38 = arith.constant 0 : index
    %49 = vector.load %arg7[%c0_37, %c0_38] : memref<8x1xf32, #tpu.memory_space<vmem>>, vector<8x1xf32>
    %50 = vector.shape_cast %49 : vector<8x1xf32> to vector<8x1xf32>
    %51 = vector.broadcast %50 : vector<8x1xf32> to vector<8x64xf32>
    %cst_39 = arith.constant dense<0.000000e+00> : vector<256x64xf32>
    %52 = tpu.matmul %25, %51, %cst_39 {dimension_numbers = #tpu.dot_dimension_numbers<[1], [0], [0], [1], [0, 0, 1, 1], [], []>} : vector<256x8xf32>, vector<8x64xf32>, vector<256x64xf32> -> vector<256x64xf32>
    %53 = arith.mulf %34, %48 : vector<256x64xf32>
    %54 = arith.addf %53, %52 : vector<256x64xf32>
    %cst_40 = arith.constant 0.000000e+00 : f32
    %55 = vector.broadcast %cst_40 : f32 to vector<256x64xf32>
    %56 = arith.maximumf %54, %55 : vector<256x64xf32>
    %c0_41 = arith.constant 0 : index
    %c0_42 = arith.constant 0 : index
    %57 = vector.load %arg8[%c0_41, %c0_42] : memref<256x64xf32, #tpu.memory_space<vmem>>, vector<256x64xf32>
    tpu.vector_store %arg8[%c0_41, %c0_42], %56 {strides = array<i32>} : memref<256x64xf32, #tpu.memory_space<vmem>>, vector<256x64xf32>,
    return
  }
  func.func @transform_0(%arg0: i32) -> (i32, i32) {
    %c0_i32 = arith.constant 0 : i32
    %c0_i32_0 = arith.constant 0 : i32
    %c0_i32_1 = arith.constant 0 : i32
    return %c0_i32, %c0_i32_0 : i32, i32
  }
  func.func @transform_1(%arg0: i32) -> (i32, i32, i32) {
    %c0_i32 = arith.constant 0 : i32
    %c0_i32_0 = arith.constant 0 : i32
    %c0_i32_1 = arith.constant 0 : i32
    %c0_i32_2 = arith.constant 0 : i32
    return %c0_i32, %c0_i32_0, %c0_i32_1 : i32, i32, i32
  }
  func.func @transform_2(%arg0: i32) -> (i32, i32, i32) {
    %c0_i32 = arith.constant 0 : i32
    %c0_i32_0 = arith.constant 0 : i32
    %c0_i32_1 = arith.constant 0 : i32
    %c0_i32_2 = arith.constant 0 : i32
    return %c0_i32, %c0_i32_0, %c0_i32_1 : i32, i32, i32
  }
  func.func @transform_3(%arg0: i32) -> (i32, i32) {
    %c0_i32 = arith.constant 0 : i32
    %c0_i32_0 = arith.constant 0 : i32
    %c0_i32_1 = arith.constant 0 : i32
    return %c0_i32, %c0_i32_0 : i32, i32
  }
  func.func @transform_4(%arg0: i32) -> (i32, i32) {
    %c0_i32 = arith.constant 0 : i32
    %c0_i32_0 = arith.constant 0 : i32
    %c0_i32_1 = arith.constant 0 : i32
    return %c0_i32, %c0_i32_0 : i32, i32
  }
  func.func @transform_5(%arg0: i32) -> (i32, i32) {
    %c0_i32 = arith.constant 0 : i32
    %c0_i32_0 = arith.constant 0 : i32
    %c0_i32_1 = arith.constant 0 : i32
    return %c0_i32, %c0_i32_0 : i32, i32
  }
  func.func @transform_6(%arg0: i32) -> (i32, i32) {
    %c0_i32 = arith.constant 0 : i32
    %c0_i32_0 = arith.constant 0 : i32
    %c0_i32_1 = arith.constant 0 : i32
    return %c0_i32, %c0_i32_0 : i32, i32
  }
  func.func @transform_7(%arg0: i32) -> (i32, i32) {
    %c0_i32 = arith.constant 0 : i32
    %c0_i32_0 = arith.constant 0 : i32
    %c0_i32_1 = arith.constant 0 : i32
    return %c0_i32, %c0_i32_0 : i32, i32
  }
}

</mosaic_0001>

<bundles_post_ra>
// kernel: tpu_custom_call.1
= control target key start
LH: loop header
LB: loop body
LE: loop exit
PB: predicated region body
PF: predicated region fallthrough
CT: control target
= control target key end

     0   :  { %vm171_vm0 = vcmask 523264   ;;  %vm756_vm1 = vcmask 261120   ;;  %vm1891_vm2 = vcmask 64512   ;;  %s5382_s0 = inlined_call_operand.vmem [shape: bf16[64,32], index: 0, kind: input, shape index: {}]   ;;  %s5383_s1 = inlined_call_operand.vmem [shape: bf16[3,256,64], index: 1, kind: input, shape index: {}]   ;;  %s5384_s2 = inlined_call_operand.vmem [shape: bf16[3,32,64], index: 2, kind: input, shape index: {}]   ;;  %s5385_s3 = inlined_call_operand.vmem [shape: f32[8,256], index: 3, kind: input, shape index: {}]   ;;  %s5386_s4 = inlined_call_operand.vmem [shape: f32[256,8], index: 4, kind: input, shape index: {}]   ;;  %s5387_s5 = inlined_call_operand.vmem [shape: f32[8,1], index: 5, kind: input, shape index: {}]   ;;  %s5388_s6 = inlined_call_operand.vmem [shape: f32[8,1], index: 6, kind: input, shape index: {}]   ;;  %s5389_s7 = inlined_call_operand.vmem [shape: f32[256,64], index: 7, kind: output, shape index: {}]  }
   0x1   :  { %v4064_v0 = vld [vmem:[%s5382_s0] sm:$0xff]   ;;  %v4065_v1 = vld [vmem:[%s5382_s0 + $0x8] sm:$0xff]   ;;  %v4066_v2 = vld [vmem:[%s5382_s0 + $0x10] sm:$0xff]  }
   0x2   :  { %3593 = vmatprep.subr.bf16.mxu1 %v4064_v0  ;;  %3553 = vmatprep.subr.bf16.mxu0 %v4064_v0  ;;  %v4068_v3 = vld [vmem:[%s5383_s1 + $0x80] sm:$0xff]   ;;  %v4067_v4 = vld [vmem:[%s5382_s0 + $0x18] sm:$0xff]   ;;  %v4069_v5 = vld [vmem:[%s5383_s1 + $0x88] sm:$0xff]  }
   0x3   :  { %3594 = vmatpush3.bf16.msra.mxu1 %v4064_v0  ;;  %3554 = vmatpush3.bf16.msra.mxu0 %v4064_v0  ;;  %v4070_v6 = vld [vmem:[%s5383_s1 + $0x90] sm:$0xff]   ;;  %v4071_v7 = vld [vmem:[%s5383_s1 + $0x98] sm:$0xff]   ;;  %v4084_v8 = vld [vmem:[%s5383_s1] sm:$0xff]  }
   0x4   :  { %3595 = vmatprep.subr.bf16.mxu1 %v4065_v1  ;;  %3555 = vmatprep.subr.bf16.mxu0 %v4065_v1  ;;  %v4085_v9 = vld [vmem:[%s5383_s1 + $0x8] sm:$0xff]   ;;  %v4086_v10 = vld [vmem:[%s5383_s1 + $0x10] sm:$0xff]   ;;  %v4072_v11 = vld [vmem:[%s5383_s1 + $0xa0] sm:$0xff]  }
   0x5   :  { %3601 = vmatprep.mubr.msk.bf16.mxu1 %vm171_vm0, %v4068_v3  ;;  %3561 = vmatprep.mubr.msk.bf16.mxu0 %vm171_vm0, %v4084_v8  ;;  %v4087_v12 = vld [vmem:[%s5383_s1 + $0x18] sm:$0xff]   ;;  %v4088_v13 = vld [vmem:[%s5383_s1 + $0x20] sm:$0xff]   ;;  %v4073_v14 = vld [vmem:[%s5383_s1 + $0xa8] sm:$0xff]  }
   0x6   :  { %v4074_v15 = vld [vmem:[%s5383_s1 + $0xb0] sm:$0xff]   ;;  %v4089_v16 = vld [vmem:[%s5383_s1 + $0x28] sm:$0xff]   ;;  %v4075_v18 = vld [vmem:[%s5383_s1 + $0xb8] sm:$0xff]  }
   0x7   :  { %3596 = vmatpush3.bf16.msra.mxu1 %v4065_v1  ;;  %3556 = vmatpush3.bf16.msra.mxu0 %v4065_v1  ;;  %v4090_v17 = vld [vmem:[%s5383_s1 + $0x30] sm:$0xff]   ;;  %v4076_v19 = vld [vmem:[%s5383_s1 + $0xc0] sm:$0xff]   ;;  %v4091_v20 = vld [vmem:[%s5383_s1 + $0x38] sm:$0xff]  }
   0x8   :  { %3597 = vmatprep.subr.bf16.mxu1 %v4066_v2  ;;  %3557 = vmatprep.subr.bf16.mxu0 %v4066_v2  ;;  %v4092_v21 = vld [vmem:[%s5383_s1 + $0x40] sm:$0xff]   ;;  %v4077_v22 = vld [vmem:[%s5383_s1 + $0xc8] sm:$0xff]   ;;  %v4078_v23 = vld [vmem:[%s5383_s1 + $0xd0] sm:$0xff]  }
   0x9   :  { %v4093_v24 = vld [vmem:[%s5383_s1 + $0x48] sm:$0xff]   ;;  %v4094_v25 = vld [vmem:[%s5383_s1 + $0x50] sm:$0xff]   ;;  %v4079_v26 = vld [vmem:[%s5383_s1 + $0xd8] sm:$0xff]  }
   0xa   :  { %v4116_v27 = vld [vmem:[%s5384_s2 + $0x10] sm:$0xff]   ;;  %v4080_v28 = vld [vmem:[%s5383_s1 + $0xe0] sm:$0xff]   ;;  %v4095_v29 = vld [vmem:[%s5383_s1 + $0x58] sm:$0xff]  }
   0xb   :  { %3598 = vmatpush3.bf16.msra.mxu1 %v4066_v2  ;;  %3558 = vmatpush3.bf16.msra.mxu0 %v4066_v2  ;;  %v4096_v30 = vld [vmem:[%s5383_s1 + $0x60] sm:$0xff]   ;;  %v4081_v31 = vld [vmem:[%s5383_s1 + $0xe8] sm:$0xff]   ;;  %v4082_v32 = vld [vmem:[%s5383_s1 + $0xf0] sm:$0xff]  }
   0xc   :  { %3599 = vmatprep.subr.bf16.mxu1 %v4067_v4  ;;  %3559 = vmatprep.subr.bf16.mxu0 %v4067_v4  ;;  %v4097_v33 = vld [vmem:[%s5383_s1 + $0x68] sm:$0xff]   ;;  %v4098_v34 = vld [vmem:[%s5383_s1 + $0x70] sm:$0xff]   ;;  %v4083_v35 = vld [vmem:[%s5383_s1 + $0xf8] sm:$0xff]  }
   0xd   :  { %v4100_v36 = vld [vmem:[%s5383_s1 + $0x100] sm:$0xff]   ;;  %v4099_v37 = vld [vmem:[%s5383_s1 + $0x78] sm:$0xff]   ;;  %v4101_v38 = vld [vmem:[%s5383_s1 + $0x108] sm:$0xff]  }
   0xe   :  { %v4102_v39 = vld [vmem:[%s5383_s1 + $0x110] sm:$0xff]   ;;  %v4103_v40 = vld [vmem:[%s5383_s1 + $0x118] sm:$0xff]   ;;  %v4104_v41 = vld [vmem:[%s5383_s1 + $0x120] sm:$0xff]  }
   0xf   :  { %3600 = vmatpush3.bf16.msra.mxu1 %v4067_v4  ;;  %3560 = vmatpush3.bf16.msra.mxu0 %v4067_v4  ;;  %v4105_v42 = vld [vmem:[%s5383_s1 + $0x128] sm:$0xff]   ;;  %v4106_v43 = vld [vmem:[%s5383_s1 + $0x130] sm:$0xff]   ;;  %v4107_v44 = vld [vmem:[%s5383_s1 + $0x138] sm:$0xff]  }
  0x10   :  { %3705 = vmatprep.subr.bf16.mxu1 %v4064_v0  ;;  %3633 = vmatprep.subr.bf16.mxu0 %v4116_v27  ;;  %v4117_v45 = vld [vmem:[%s5384_s2 + $0x18] sm:$0xff]   ;;  %v4108_v46 = vld [vmem:[%s5383_s1 + $0x140] sm:$0xff]   ;;  %v4109_v47 = vld [vmem:[%s5383_s1 + $0x148] sm:$0xff]  }
  0x11   :  { %v4110_v48 = vld [vmem:[%s5383_s1 + $0x150] sm:$0xff]   ;;  %v4111_v49 = vld [vmem:[%s5383_s1 + $0x158] sm:$0xff]   ;;  %v4112_v50 = vld [vmem:[%s5383_s1 + $0x160] sm:$0xff]  }
  0x12   :  { %3602 = vmatmul.mubr.msk.bf16.vlgmr.msra.gmra.mrb[0].mxu1 %vm171_vm0, %v4069_v5  ;;  %3562 = vmatmul.mubr.msk.bf16.vlgmr.msra.gmra.mrb[0].mxu0 %vm171_vm0, %v4085_v9  ;;  %v4113_v51 = vld [vmem:[%s5383_s1 + $0x168] sm:$0xff]   ;;  %v4114_v52 = vld [vmem:[%s5383_s1 + $0x170] sm:$0xff]   ;;  %v4115_v53 = vld [vmem:[%s5383_s1 + $0x178] sm:$0xff]  }
  0x13   :  { %3605 = vmatprep.mubr.msk.bf16.mxu1 %vm171_vm0, %v4070_v6  ;;  %3706 = vmatpush3.bf16.msra.mxu1 %v4064_v0  ;;  %v4118_v54 = vld [vmem:[%s5384_s2] sm:$0xff]   ;;  %v4119_v62 = vld [vmem:[%s5384_s2 + $0x8] sm:$0xff]  }
  0x14   :  { %3707 = vmatprep.subr.bf16.mxu1 %v4065_v1  ;;  %3565 = vmatprep.mubr.msk.bf16.mxu0 %vm171_vm0, %v4086_v10  ;;  %v4398_v6 = vld [vmem:[%s5384_s2 + $0x20] sm:$0xff]  }
  0x15   :  { %3634 = vmatpush3.bf16.msra.mxu0 %v4116_v27 }
  0x16   :  { %3635 = vmatprep.subr.bf16.mxu0 %v4117_v45 }
  0x17   :  { %3708 = vmatpush3.bf16.msra.mxu1 %v4065_v1 }
  0x18   :  { %3709 = vmatprep.subr.bf16.mxu1 %v4066_v2 }
  0x19   :  { %3636 = vmatpush3.bf16.msra.mxu0 %v4117_v45 }
  0x1a   :  { %3606 = vmatmul.mubr.msk.bf16.gmra.mrb[4].mxu1 %vm171_vm0, %v4071_v7  ;;  %3566 = vmatmul.mubr.msk.bf16.gmra.mrb[4].mxu0 %vm171_vm0, %v4087_v12 }
  0x1b   :  { %3609 = vmatprep.mubr.msk.bf16.mxu1 %vm171_vm0, %v4072_v11  ;;  %3710 = vmatpush3.bf16.msra.mxu1 %v4066_v2 }
  0x1c   :  { %3711 = vmatprep.subr.bf16.mxu1 %v4067_v4  ;;  %3569 = vmatprep.mubr.msk.bf16.mxu0 %vm171_vm0, %v4088_v13 }
  0x1d   :  { %3669 = vmatprep.subr.bf16.mxu0 %v4118_v54 }
  0x1f   :  { %3712 = vmatpush3.bf16.msra.mxu1 %v4067_v4 }
  0x22   :  { %3610 = vmatmul.mubr.msk.bf16.gmra.mrb[8].mxu1 %vm171_vm0, %v4073_v14  ;;  %3570 = vmatmul.mubr.msk.bf16.gmra.mrb[8].mxu0 %vm171_vm0, %v4089_v16 }
  0x23   :  { %3613 = vmatprep.mubr.msk.bf16.mxu1 %vm171_vm0, %v4074_v15  ;;  %3573 = vmatprep.mubr.msk.bf16.mxu0 %vm171_vm0, %v4090_v17 }
  0x2a   :  { %3614 = vmatmul.mubr.msk.bf16.gmra.mrb[12].mxu1 %vm171_vm0, %v4075_v18  ;;  %3574 = vmatmul.mubr.msk.bf16.gmra.mrb[12].mxu0 %vm171_vm0, %v4091_v20 }
  0x2b   :  { %3617 = vmatprep.mubr.msk.bf16.mxu1 %vm171_vm0, %v4076_v19  ;;  %3577 = vmatprep.mubr.msk.bf16.mxu0 %vm171_vm0, %v4092_v21 }
  0x32   :  { %3618 = vmatmul.mubr.msk.bf16.gmra.mrb[16].mxu1 %vm171_vm0, %v4077_v22  ;;  %3578 = vmatmul.mubr.msk.bf16.gmra.mrb[16].mxu0 %vm171_vm0, %v4093_v24 }
  0x33   :  { %3621 = vmatprep.mubr.msk.bf16.mxu1 %vm171_vm0, %v4078_v23  ;;  %3581 = vmatprep.mubr.msk.bf16.mxu0 %vm171_vm0, %v4094_v25 }
  0x3a   :  { %3622 = vmatmul.mubr.msk.bf16.gmra.mrb[20].mxu1 %vm171_vm0, %v4079_v26  ;;  %3582 = vmatmul.mubr.msk.bf16.gmra.mrb[20].mxu0 %vm171_vm0, %v4095_v29 }
  0x3b   :  { %3625 = vmatprep.mubr.msk.bf16.mxu1 %vm171_vm0, %v4080_v28  ;;  %3585 = vmatprep.mubr.msk.bf16.mxu0 %vm171_vm0, %v4096_v30 }
  0x42   :  { %3626 = vmatmul.mubr.msk.bf16.gmra.mrb[24].mxu1 %vm171_vm0, %v4081_v31  ;;  %3586 = vmatmul.mubr.msk.bf16.gmra.mrb[24].mxu0 %vm171_vm0, %v4097_v33 }
  0x43   :  { %3629 = vmatprep.mubr.msk.bf16.mxu1 %vm171_vm0, %v4082_v32  ;;  %3589 = vmatprep.mubr.msk.bf16.mxu0 %vm171_vm0, %v4098_v34 }
  0x4a   :  { %3630 = vmatmul.mubr.msk.bf16.gmra.mrb[28].mxu1 %vm171_vm0, %v4083_v35  ;;  %3590 = vmatmul.mubr.msk.bf16.gmra.mrb[28].mxu0 %vm171_vm0, %v4099_v37 }
  0x4b   :  { %3713 = vmatprep.mubr.msk.bf16.mxu1 %vm171_vm0, %v4100_v36 }
  0x52   :  { %3714 = vmatmul.mubr.msk.bf16.vlgmr.msra.gmra.mrb[32].mxu1 %vm171_vm0, %v4101_v38 }
  0x53   :  { %3717 = vmatprep.mubr.msk.bf16.mxu1 %vm171_vm0, %v4102_v39 }
  0x5a   :  { %3718 = vmatmul.mubr.msk.bf16.gmra.mrb[36].mxu1 %vm171_vm0, %v4103_v40 }
  0x5b   :  { %3721 = vmatprep.mubr.msk.bf16.mxu1 %vm171_vm0, %v4104_v41 }
  0x62   :  { %3722 = vmatmul.mubr.msk.bf16.gmra.mrb[40].mxu1 %vm171_vm0, %v4105_v42 }
  0x63   :  { %3725 = vmatprep.mubr.msk.bf16.mxu1 %vm171_vm0, %v4106_v43 }
  0x6a   :  { %3726 = vmatmul.mubr.msk.bf16.gmra.mrb[44].mxu1 %vm171_vm0, %v4107_v44 }
  0x6b   :  { %3729 = vmatprep.mubr.msk.bf16.mxu1 %vm171_vm0, %v4108_v46 }
  0x72   :  { %3730 = vmatmul.mubr.msk.bf16.gmra.mrb[48].mxu1 %vm171_vm0, %v4109_v47 }
  0x73   :  { %3733 = vmatprep.mubr.msk.bf16.mxu1 %vm171_vm0, %v4110_v48 }
  0x7a   :  { %3734 = vmatmul.mubr.msk.bf16.gmra.mrb[52].mxu1 %vm171_vm0, %v4111_v49 }
  0x7b   :  { %3737 = vmatprep.mubr.msk.bf16.mxu1 %vm171_vm0, %v4112_v50 }
  0x82   :  { %3738 = vmatmul.mubr.msk.bf16.gmra.mrb[56].mxu1 %vm171_vm0, %v4113_v51 }
  0x83   :  { %3741 = vmatprep.mubr.msk.bf16.mxu1 %vm171_vm0, %v4114_v52 }
  0x8a   :  { %3742 = vmatmul.mubr.msk.bf16.gmra.mrb[60].mxu1 %vm171_vm0, %v4115_v53 }
  0xe5   :  { %v3603_v55 = vpop.f32.mrb[0].mxu1  ;;  %v4378_v61 = vpop.f32.mrb[0].mxu0 }
  0xe6   :  { %v596_v56 = vpop.f32.mrb[1].mxu1  ;;  %v4384_v63 = vpop.f32.mrb[1].mxu0 }
  0xe7   :  { %v3604_v57 = vpop.f32.mrb[2].mxu1  ;;  %v4387_v0 = vpop.f32.mrb[2].mxu0 }
  0xe8   :  { %v724_v58 = vpack.c.bf16 %v3604_v57, %v3603_v55  ;;  %v599_v59 = vpop.f32.mrb[3].mxu1  ;;  %v382_v2 = vpack.c.bf16 %v4387_v0, %v4378_v61  ;;  %v4391_v3 = vpop.f32.mrb[3].mxu0 }
  0xe9   :  { %v723_v60 = vpack.c.bf16 %v599_v59, %v596_v56  ;;  %v381_v5 = vpack.c.bf16 %v4391_v3, %v4384_v63  ;;  %v4121_v3 = vld [vmem:[%s5384_s2 + $0x28] sm:$0xff]  }
  0xeb   :  { %3637 = vmatprep.mubr.msk.bf16.mxu0 %vm756_vm1, %v723_v60 }
  0xec   :  { %3638 = vmatmul.mubr.msk.bf16.vlgmr.msra.gmra.mrb[32].mxu0 %vm756_vm1, %v724_v58 }
  0xed   :  { %v3607_v1 = vpop.f32.mrb[4].mxu1  ;;  %3670 = vmatpush3.bf16.msra.mxu0 %v4118_v54  ;;  %v4400_v11 = vpop.f32.mrb[4].mxu0 }
  0xee   :  { %v612_v4 = vpop.f32.mrb[5].mxu1  ;;  %3671 = vmatprep.subr.bf16.mxu0 %v4119_v62  ;;  %v4404_v12 = vpop.f32.mrb[5].mxu0 }
  0xef   :  { %v3608_v7 = vpop.f32.mrb[6].mxu1  ;;  %v4407_v13 = vpop.f32.mrb[6].mxu0 }
  0xf0   :  { %v726_v8 = vpack.c.bf16 %v3608_v7, %v3607_v1  ;;  %v615_v9 = vpop.f32.mrb[7].mxu1  ;;  %v384_v15 = vpack.c.bf16 %v4407_v13, %v4400_v11  ;;  %v4411_v16 = vpop.f32.mrb[7].mxu0 }
  0xf1   :  { %v725_v10 = vpack.c.bf16 %v615_v9, %v612_v4  ;;  %3672 = vmatpush3.bf16.msra.mxu0 %v4119_v62  ;;  %v383_v18 = vpack.c.bf16 %v4411_v16, %v4404_v12 }
  0xf2   :  { %3745 = vmatprep.subr.bf16.mxu0 %v4398_v6 }
  0xf3   :  { %3641 = vmatprep.mubr.msk.bf16.mxu0 %vm756_vm1, %v725_v10 }
  0xf4   :  { %3642 = vmatmul.mubr.msk.bf16.gmra.mrb[36].mxu0 %vm756_vm1, %v726_v8 }
  0xf5   :  { %v3611_v14 = vpop.f32.mrb[8].mxu1  ;;  %v4415_v23 = vpop.f32.mrb[8].mxu0 }
  0xf6   :  { %v628_v17 = vpop.f32.mrb[9].mxu1  ;;  %v4418_v24 = vpop.f32.mrb[9].mxu0 }
  0xf7   :  { %v3612_v19 = vpop.f32.mrb[10].mxu1  ;;  %v4421_v25 = vpop.f32.mrb[10].mxu0 }
  0xf8   :  { %v728_v20 = vpack.c.bf16 %v3612_v19, %v3611_v14  ;;  %v631_v21 = vpop.f32.mrb[11].mxu1  ;;  %v386_v27 = vpack.c.bf16 %v4421_v25, %v4415_v23  ;;  %v4425_v28 = vpop.f32.mrb[11].mxu0 }
  0xf9   :  { %v727_v22 = vpack.c.bf16 %v631_v21, %v628_v17  ;;  %v385_v30 = vpack.c.bf16 %v4425_v28, %v4418_v24 }
  0xfb   :  { %3645 = vmatprep.mubr.msk.bf16.mxu0 %vm756_vm1, %v727_v22 }
  0xfc   :  { %3646 = vmatmul.mubr.msk.bf16.gmra.mrb[40].mxu0 %vm756_vm1, %v728_v20 }
  0xfd   :  { %v3615_v26 = vpop.f32.mrb[12].mxu1  ;;  %v4429_v35 = vpop.f32.mrb[12].mxu0 }
  0xfe   :  { %v644_v29 = vpop.f32.mrb[13].mxu1  ;;  %v4432_v36 = vpop.f32.mrb[13].mxu0 }
  0xff   :  { %v3616_v31 = vpop.f32.mrb[14].mxu1  ;;  %v4435_v37 = vpop.f32.mrb[14].mxu0 }
 0x100   :  { %v730_v32 = vpack.c.bf16 %v3616_v31, %v3615_v26  ;;  %v647_v33 = vpop.f32.mrb[15].mxu1  ;;  %v388_v39 = vpack.c.bf16 %v4435_v37, %v4429_v35  ;;  %v4439_v40 = vpop.f32.mrb[15].mxu0 }
 0x101   :  { %v729_v34 = vpack.c.bf16 %v647_v33, %v644_v29  ;;  %v387_v42 = vpack.c.bf16 %v4439_v40, %v4432_v36 }
 0x103   :  { %3649 = vmatprep.mubr.msk.bf16.mxu0 %vm756_vm1, %v729_v34 }
 0x104   :  { %3650 = vmatmul.mubr.msk.bf16.gmra.mrb[44].mxu0 %vm756_vm1, %v730_v32 }
 0x105   :  { %v3619_v38 = vpop.f32.mrb[16].mxu1  ;;  %v4443_v47 = vpop.f32.mrb[16].mxu0 }
 0x106   :  { %v660_v41 = vpop.f32.mrb[17].mxu1  ;;  %v4446_v48 = vpop.f32.mrb[17].mxu0 }
 0x107   :  { %v3620_v43 = vpop.f32.mrb[18].mxu1  ;;  %v4449_v49 = vpop.f32.mrb[18].mxu0 }
 0x108   :  { %v732_v44 = vpack.c.bf16 %v3620_v43, %v3619_v38  ;;  %v663_v45 = vpop.f32.mrb[19].mxu1  ;;  %v390_v51 = vpack.c.bf16 %v4449_v49, %v4443_v47  ;;  %v4453_v52 = vpop.f32.mrb[19].mxu0 }
 0x109   :  { %v731_v46 = vpack.c.bf16 %v663_v45, %v660_v41  ;;  %v389_v54 = vpack.c.bf16 %v4453_v52, %v4446_v48 }
 0x10b   :  { %3653 = vmatprep.mubr.msk.bf16.mxu0 %vm756_vm1, %v731_v46 }
 0x10c   :  { %3654 = vmatmul.mubr.msk.bf16.gmra.mrb[48].mxu0 %vm756_vm1, %v732_v44 }
 0x10d   :  { %v3623_v50 = vpop.f32.mrb[20].mxu1  ;;  %v4457_v59 = vpop.f32.mrb[20].mxu0 }
 0x10e   :  { %v676_v53 = vpop.f32.mrb[21].mxu1  ;;  %v4460_v60 = vpop.f32.mrb[21].mxu0 }
 0x10f   :  { %v3624_v55 = vpop.f32.mrb[22].mxu1  ;;  %v4463_v62 = vpop.f32.mrb[22].mxu0 }
 0x110   :  { %v734_v56 = vpack.c.bf16 %v3624_v55, %v3623_v50  ;;  %v679_v57 = vpop.f32.mrb[23].mxu1  ;;  %v392_v4 = vpack.c.bf16 %v4463_v62, %v4457_v59  ;;  %v4467_v7 = vpop.f32.mrb[23].mxu0 }
 0x111   :  { %v733_v58 = vpack.c.bf16 %v679_v57, %v676_v53  ;;  %v391_v9 = vpack.c.bf16 %v4467_v7, %v4460_v60 }
 0x113   :  { %3657 = vmatprep.mubr.msk.bf16.mxu0 %vm756_vm1, %v733_v58 }
 0x114   :  { %3658 = vmatmul.mubr.msk.bf16.gmra.mrb[52].mxu0 %vm756_vm1, %v734_v56 }
 0x115   :  { %v3627_v1 = vpop.f32.mrb[24].mxu1  ;;  %v4471_v20 = vpop.f32.mrb[24].mxu0 }
 0x116   :  { %v692_v8 = vpop.f32.mrb[25].mxu1  ;;  %v4474_v21 = vpop.f32.mrb[25].mxu0 }
 0x117   :  { %v3628_v10 = vpop.f32.mrb[26].mxu1  ;;  %v4477_v22 = vpop.f32.mrb[26].mxu0 }
 0x118   :  { %v736_v14 = vpack.c.bf16 %v3628_v10, %v3627_v1  ;;  %v695_v17 = vpop.f32.mrb[27].mxu1  ;;  %v394_v29 = vpack.c.bf16 %v4477_v22, %v4471_v20  ;;  %v4481_v31 = vpop.f32.mrb[27].mxu0  ;;  %v4595_v20 = vld [vmem:[%s5385_s3 + $0x8] sm:$0xff] }
 0x119   :  { %v735_v19 = vpack.c.bf16 %v695_v17, %v692_v8  ;;  %v393_v33 = vpack.c.bf16 %v4481_v31, %v4474_v21  ;;  %1881 = vmatprep.mubr.f32.mxu1 %v4595_v20 }
 0x11b   :  { %3661 = vmatprep.mubr.msk.bf16.mxu0 %vm756_vm1, %v735_v19 }
 0x11c   :  { %3662 = vmatmul.mubr.msk.bf16.gmra.mrb[56].mxu0 %vm756_vm1, %v736_v14 }
 0x11d   :  { %v3631_v26 = vpop.f32.mrb[28].mxu1  ;;  %v4485_v44 = vpop.f32.mrb[28].mxu0 }
 0x11e   :  { %v708_v32 = vpop.f32.mrb[29].mxu1  ;;  %v4488_v45 = vpop.f32.mrb[29].mxu0 }
 0x11f   :  { %v3632_v34 = vpop.f32.mrb[30].mxu1  ;;  %v4491_v46 = vpop.f32.mrb[30].mxu0 }
 0x120   :  { %v738_v38 = vpack.c.bf16 %v3632_v34, %v3631_v26  ;;  %v711_v41 = vpop.f32.mrb[31].mxu1  ;;  %v396_v50 = vpack.c.bf16 %v4491_v46, %v4485_v44  ;;  %v369_v53 = vpop.f32.mrb[31].mxu0 }
 0x121   :  { %v737_v43 = vpack.c.bf16 %v711_v41, %v708_v32  ;;  %v395_v56 = vpack.c.bf16 %v369_v53, %v4488_v45 }
 0x123   :  { %3665 = vmatprep.mubr.msk.bf16.mxu0 %vm756_vm1, %v737_v43 }
 0x124   :  { %3666 = vmatmul.mubr.msk.bf16.gmra.mrb[60].mxu0 %vm756_vm1, %v738_v38 }
 0x125   :  { %3673 = vmatprep.mubr.msk.bf16.mxu0 %vm756_vm1, %v381_v5  ;;  %v4499_v55 = vpop.f32.mrb[32].mxu1 }
 0x126   :  { %v4502_v57 = vpop.f32.mrb[33].mxu1 }
 0x127   :  { %v4504_v58 = vpop.f32.mrb[34].mxu1 }
 0x128   :  { %v1510_v1 = vpack.c.bf16 %v4504_v58, %v4499_v55  ;;  %v4508_v8 = vpop.f32.mrb[35].mxu1 }
 0x129   :  { %v1509_v63 = vpack.c.bf16 %v4508_v8, %v4502_v57 }
 0x12c   :  { %3674 = vmatmul.mubr.msk.bf16.vlgmr.msra.gmra.mrb[32].mxu0 %vm756_vm1, %v382_v2 }
 0x12d   :  { %3677 = vmatprep.mubr.msk.bf16.mxu0 %vm756_vm1, %v383_v18  ;;  %3746 = vmatpush3.bf16.msra.mxu0 %v4398_v6  ;;  %v3719_v5 = vpop.f32.mrb[36].mxu1 }
 0x12e   :  { %3747 = vmatprep.subr.bf16.mxu0 %v4121_v3  ;;  %v1398_v10 = vpop.f32.mrb[37].mxu1 }
 0x12f   :  { %v3720_v14 = vpop.f32.mrb[38].mxu1 }
 0x130   :  { %v1512_v17 = vpack.c.bf16 %v3720_v14, %v3719_v5  ;;  %v1401_v19 = vpop.f32.mrb[39].mxu1 }
 0x131   :  { %3748 = vmatpush3.bf16.msra.mxu0 %v4121_v3  ;;  %v1511_v26 = vpack.c.bf16 %v1401_v19, %v1398_v10 }
 0x134   :  { %3678 = vmatmul.mubr.msk.bf16.gmra.mrb[36].mxu0 %vm756_vm1, %v384_v15 }
 0x135   :  { %3681 = vmatprep.mubr.msk.bf16.mxu0 %vm756_vm1, %v385_v30  ;;  %v3723_v61 = vpop.f32.mrb[40].mxu1 }
 0x136   :  { %v1414_v0 = vpop.f32.mrb[41].mxu1 }
 0x137   :  { %v3724_v2 = vpop.f32.mrb[42].mxu1 }
 0x138   :  { %v1514_v6 = vpack.c.bf16 %v3724_v2, %v3723_v61  ;;  %v1417_v12 = vpop.f32.mrb[43].mxu1 }
 0x139   :  { %v1513_v16 = vpack.c.bf16 %v1417_v12, %v1414_v0 }
 0x13c   :  { %3682 = vmatmul.mubr.msk.bf16.gmra.mrb[40].mxu0 %vm756_vm1, %v386_v27 }
 0x13d   :  { %3685 = vmatprep.mubr.msk.bf16.mxu0 %vm756_vm1, %v387_v42  ;;  %v3727_v11 = vpop.f32.mrb[44].mxu1 }
 0x13e   :  { %v1430_v13 = vpop.f32.mrb[45].mxu1 }
 0x13f   :  { %v3728_v15 = vpop.f32.mrb[46].mxu1 }
 0x140   :  { %v1516_v18 = vpack.c.bf16 %v3728_v15, %v3727_v11  ;;  %v1433_v24 = vpop.f32.mrb[47].mxu1 }
 0x141   :  { %v1515_v28 = vpack.c.bf16 %v1433_v24, %v1430_v13 }
 0x144   :  { %3686 = vmatmul.mubr.msk.bf16.gmra.mrb[44].mxu0 %vm756_vm1, %v388_v39 }
 0x145   :  { %3689 = vmatprep.mubr.msk.bf16.mxu0 %vm756_vm1, %v389_v54  ;;  %v3731_v23 = vpop.f32.mrb[48].mxu1 }
 0x146   :  { %v1446_v25 = vpop.f32.mrb[49].mxu1 }
 0x147   :  { %v3732_v27 = vpop.f32.mrb[50].mxu1 }
 0x148   :  { %v1518_v30 = vpack.c.bf16 %v3732_v27, %v3731_v23  ;;  %v1449_v36 = vpop.f32.mrb[51].mxu1 }
 0x149   :  { %v1517_v40 = vpack.c.bf16 %v1449_v36, %v1446_v25 }
 0x14c   :  { %3690 = vmatmul.mubr.msk.bf16.gmra.mrb[48].mxu0 %vm756_vm1, %v390_v51 }
 0x14d   :  { %3693 = vmatprep.mubr.msk.bf16.mxu0 %vm756_vm1, %v391_v9  ;;  %v3735_v35 = vpop.f32.mrb[52].mxu1 }
 0x14e   :  { %v1462_v37 = vpop.f32.mrb[53].mxu1 }
 0x14f   :  { %v3736_v39 = vpop.f32.mrb[54].mxu1 }
 0x150   :  { %v1520_v42 = vpack.c.bf16 %v3736_v39, %v3735_v35  ;;  %v1465_v48 = vpop.f32.mrb[55].mxu1 }
 0x151   :  { %v1519_v52 = vpack.c.bf16 %v1465_v48, %v1462_v37 }
 0x154   :  { %3694 = vmatmul.mubr.msk.bf16.gmra.mrb[52].mxu0 %vm756_vm1, %v392_v4 }
 0x155   :  { %3697 = vmatprep.mubr.msk.bf16.mxu0 %vm756_vm1, %v393_v33  ;;  %v3739_v47 = vpop.f32.mrb[56].mxu1 }
 0x156   :  { %v1478_v49 = vpop.f32.mrb[57].mxu1 }
 0x157   :  { %v3740_v51 = vpop.f32.mrb[58].mxu1 }
 0x158   :  { %v1522_v54 = vpack.c.bf16 %v3740_v51, %v3739_v47  ;;  %v1481_v60 = vpop.f32.mrb[59].mxu1  ;;  %v4704_v51 = vld [vmem:[%s5386_s4] sm:$0xff] }
 0x159   :  { %v1521_v7 = vpack.c.bf16 %v1481_v60, %v1478_v49 }
 0x15c   :  { %3698 = vmatmul.mubr.msk.bf16.gmra.mrb[56].mxu0 %vm756_vm1, %v394_v29 }
 0x15d   :  { %3701 = vmatprep.mubr.msk.bf16.mxu0 %vm756_vm1, %v395_v56  ;;  %v3743_v59 = vpop.f32.mrb[60].mxu1 }
 0x15e   :  { %v1494_v62 = vpop.f32.mrb[61].mxu1 }
 0x15f   :  { %v3744_v4 = vpop.f32.mrb[62].mxu1 }
 0x160   :  { %v1524_v9 = vpack.c.bf16 %v3744_v4, %v3743_v59  ;;  %v1497_v21 = vpop.f32.mrb[63].mxu1  ;;  %v4718_v59 = vld [vmem:[%s5386_s4 + $0x10] sm:$0xff]  ;;  %v4732_v4 = vld [vmem:[%s5386_s4 + $0x20] sm:$0xff] }
 0x161   :  { %v1523_v31 = vpack.c.bf16 %v1497_v21, %v1494_v62  ;;  %v4727_v62 = vld [vmem:[%s5386_s4 + $0x18] sm:$0xff]  ;;  %v4746_v21 = vld [vmem:[%s5386_s4 + $0x30] sm:$0xff] }
 0x164   :  { %3702 = vmatmul.mubr.msk.bf16.gmra.mrb[60].mxu0 %vm756_vm1, %v396_v50 }
 0x165   :  { %3749 = vmatprep.mubr.msk.bf16.mxu0 %vm756_vm1, %v1509_v63 }
 0x16c   :  { %3750 = vmatmul.mubr.msk.bf16.vlgmr.msra.gmra.mrb[32].mxu0 %vm756_vm1, %v1510_v1 }
 0x16d   :  { %3753 = vmatprep.mubr.msk.bf16.mxu0 %vm756_vm1, %v1511_v26 }
 0x174   :  { %3754 = vmatmul.mubr.msk.bf16.gmra.mrb[36].mxu0 %vm756_vm1, %v1512_v17 }
 0x175   :  { %3757 = vmatprep.mubr.msk.bf16.mxu0 %vm756_vm1, %v1513_v16 }
 0x17c   :  { %3758 = vmatmul.mubr.msk.bf16.gmra.mrb[40].mxu0 %vm756_vm1, %v1514_v6 }
 0x17d   :  { %3761 = vmatprep.mubr.msk.bf16.mxu0 %vm756_vm1, %v1515_v28 }
 0x184   :  { %3762 = vmatmul.mubr.msk.bf16.gmra.mrb[44].mxu0 %vm756_vm1, %v1516_v18 }
 0x185   :  { %3765 = vmatprep.mubr.msk.bf16.mxu0 %vm756_vm1, %v1517_v40 }
 0x18c   :  { %3766 = vmatmul.mubr.msk.bf16.gmra.mrb[48].mxu0 %vm756_vm1, %v1518_v30 }
 0x18d   :  { %3769 = vmatprep.mubr.msk.bf16.mxu0 %vm756_vm1, %v1519_v52 }
 0x194   :  { %3770 = vmatmul.mubr.msk.bf16.gmra.mrb[52].mxu0 %vm756_vm1, %v1520_v42  ;;  %v4697_v42 = vld [vmem:[%s5385_s3] sm:$0xff] }
 0x195   :  { %3773 = vmatprep.mubr.msk.bf16.mxu0 %vm756_vm1, %v1521_v7  ;;  %v4713_v7 = vld [vmem:[%s5386_s4 + $0x8] sm:$0xff] }
 0x19c   :  { %3774 = vmatmul.mubr.msk.bf16.gmra.mrb[56].mxu0 %vm756_vm1, %v1522_v54 }
 0x19d   :  { %3777 = vmatprep.mubr.msk.bf16.mxu0 %vm756_vm1, %v1523_v31  ;;  %v4755_v31 = vld [vmem:[%s5386_s4 + $0x38] sm:$0xff] }
 0x1a4   :  { %3778 = vmatmul.mubr.msk.bf16.gmra.mrb[60].mxu0 %vm756_vm1, %v1524_v9  ;;  %v4741_v9 = vld [vmem:[%s5386_s4 + $0x28] sm:$0xff] }
 0x1a5   :  { %3883 = vmatprep.mubr.msk.f32.mxu0 %vm1891_vm2, %v4704_v51 }
 0x23f   :  { %v4598_v22 = vpop.f32.mrb[32].mxu0 }
 0x240   :  { %v4600_v29 = vpop.f32.mrb[33].mxu0 }
 0x241   :  { %v4602_v32 = vpop.f32.mrb[34].mxu0 }
 0x242   :  { %v3937_v33 = vpack.c.bf16 %v4602_v32, %v4598_v22  ;;  %v4606_v34 = vpop.f32.mrb[35].mxu0 }
 0x243   :  { %v3933_v38 = vpack.c.bf16 %v4606_v34, %v4600_v29 }
 0x247   :  { %v4610_v41 = vpop.f32.mrb[36].mxu0 }
 0x248   :  { %v4612_v43 = vpop.f32.mrb[37].mxu0 }
 0x249   :  { %v4614_v44 = vpop.f32.mrb[38].mxu0 }
 0x24a   :  { %v3945_v45 = vpack.c.bf16 %v4614_v44, %v4610_v41  ;;  %v4618_v46 = vpop.f32.mrb[39].mxu0 }
 0x24b   :  { %v3941_v50 = vpack.c.bf16 %v4618_v46, %v4612_v43 }
 0x24f   :  { %v4622_v53 = vpop.f32.mrb[40].mxu0 }
 0x250   :  { %v4624_v55 = vpop.f32.mrb[41].mxu0 }
 0x251   :  { %v4626_v56 = vpop.f32.mrb[42].mxu0 }
 0x252   :  { %v3953_v57 = vpack.c.bf16 %v4626_v56, %v4622_v53  ;;  %v4630_v58 = vpop.f32.mrb[43].mxu0 }
 0x253   :  { %v3949_v1 = vpack.c.bf16 %v4630_v58, %v4624_v55 }
 0x257   :  { %v4634_v8 = vpop.f32.mrb[44].mxu0 }
 0x258   :  { %v4636_v63 = vpop.f32.mrb[45].mxu0 }
 0x259   :  { %v4638_v3 = vpop.f32.mrb[46].mxu0 }
 0x25a   :  { %v3961_v5 = vpack.c.bf16 %v4638_v3, %v4634_v8  ;;  %v4642_v10 = vpop.f32.mrb[47].mxu0 }
 0x25b   :  { %v3957_v14 = vpack.c.bf16 %v4642_v10, %v4636_v63 }
 0x25f   :  { %v4646_v17 = vpop.f32.mrb[48].mxu0 }
 0x260   :  { %v4648_v19 = vpop.f32.mrb[49].mxu0 }
 0x261   :  { %v4650_v26 = vpop.f32.mrb[50].mxu0 }
 0x262   :  { %v3935_v61 = vpack.c.bf16 %v4650_v26, %v4646_v17  ;;  %v4654_v0 = vpop.f32.mrb[51].mxu0 }
 0x263   :  { %v3931_v2 = vpack.c.bf16 %v4654_v0, %v4648_v19 }
 0x265   :  { %3932 = vmatprep.subr.bf16.mxu1 %v3931_v2  ;;  %v4825_v2 = vld [vmem:[%s5386_s4 + $0x88] sm:$0xff] }
 0x266   :  { %3934 = vmatpush3.bf16.msra.mxu1 %v3933_v38  ;;  %v4769_v38 = vld [vmem:[%s5386_s4 + $0x48] sm:$0xff] }
 0x267   :  { %v4658_v6 = vpop.f32.mrb[52].mxu0  ;;  %3936 = vmatprep.subr.bf16.mxu1 %v3935_v61  ;;  %v4816_v61 = vld [vmem:[%s5386_s4 + $0x80] sm:$0xff] }
 0x268   :  { %v4660_v12 = vpop.f32.mrb[53].mxu0 }
 0x269   :  { %v4662_v16 = vpop.f32.mrb[54].mxu0 }
 0x26a   :  { %v3943_v11 = vpack.c.bf16 %v4662_v16, %v4658_v6  ;;  %v4666_v13 = vpop.f32.mrb[55].mxu0  ;;  %3938 = vmatpush3.bf16.msra.mxu1 %v3937_v33  ;;  %v4760_v33 = vld [vmem:[%s5386_s4 + $0x40] sm:$0xff] }
 0x26b   :  { %v3939_v15 = vpack.c.bf16 %v4666_v13, %v4660_v12 }
 0x26d   :  { %3940 = vmatprep.subr.bf16.mxu1 %v3939_v15  ;;  %v4839_v15 = vld [vmem:[%s5386_s4 + $0x98] sm:$0xff] }
 0x26e   :  { %3942 = vmatpush3.bf16.msra.mxu1 %v3941_v50  ;;  %v4783_v50 = vld [vmem:[%s5386_s4 + $0x58] sm:$0xff] }
 0x26f   :  { %v4670_v18 = vpop.f32.mrb[56].mxu0  ;;  %3944 = vmatprep.subr.bf16.mxu1 %v3943_v11  ;;  %v4830_v11 = vld [vmem:[%s5386_s4 + $0x90] sm:$0xff] }
 0x270   :  { %v4672_v24 = vpop.f32.mrb[57].mxu0 }
 0x271   :  { %v4674_v28 = vpop.f32.mrb[58].mxu0 }
 0x272   :  { %v3951_v23 = vpack.c.bf16 %v4674_v28, %v4670_v18  ;;  %v4678_v25 = vpop.f32.mrb[59].mxu0  ;;  %3946 = vmatpush3.bf16.msra.mxu1 %v3945_v45  ;;  %v4774_v45 = vld [vmem:[%s5386_s4 + $0x50] sm:$0xff] }
 0x273   :  { %v3947_v27 = vpack.c.bf16 %v4678_v25, %v4672_v24 }
 0x275   :  { %3948 = vmatprep.subr.bf16.mxu1 %v3947_v27  ;;  %v4853_v27 = vld [vmem:[%s5386_s4 + $0xa8] sm:$0xff] }
 0x276   :  { %3950 = vmatpush3.bf16.msra.mxu1 %v3949_v1  ;;  %v4797_v1 = vld [vmem:[%s5386_s4 + $0x68] sm:$0xff]  ;;  %5419 = vst [vmem:[#allocation3_spill] sm:$0xff] %v4853_v27 }
 0x277   :  { %v4682_v30 = vpop.f32.mrb[60].mxu0  ;;  %3952 = vmatprep.subr.bf16.mxu1 %v3951_v23  ;;  %v4844_v23 = vld [vmem:[%s5386_s4 + $0xa0] sm:$0xff] }
 0x278   :  { %v4684_v36 = vpop.f32.mrb[61].mxu0  ;;  %5418 = vst [vmem:[#allocation2_spill] sm:$0xff] %v4844_v23 }
 0x279   :  { %v4686_v40 = vpop.f32.mrb[62].mxu0 }
 0x27a   :  { %v3959_v35 = vpack.c.bf16 %v4686_v40, %v4682_v30  ;;  %v4690_v37 = vpop.f32.mrb[63].mxu0  ;;  %3954 = vmatpush3.bf16.msra.mxu1 %v3953_v57  ;;  %v4788_v57 = vld [vmem:[%s5386_s4 + $0x60] sm:$0xff] }
 0x27b   :  { %v3955_v39 = vpack.c.bf16 %v4690_v37, %v4684_v36 }
 0x27d   :  { %3956 = vmatprep.subr.bf16.mxu1 %v3955_v39  ;;  %v4867_v39 = vld [vmem:[%s5386_s4 + $0xb8] sm:$0xff] }
 0x27e   :  { %3958 = vmatpush3.bf16.msra.mxu1 %v3957_v14  ;;  %v4811_v14 = vld [vmem:[%s5386_s4 + $0x78] sm:$0xff]  ;;  %5421 = vst [vmem:[#allocation5_spill] sm:$0xff] %v4867_v39 }
 0x27f   :  { %3960 = vmatprep.subr.bf16.mxu1 %v3959_v35  ;;  %v4858_v35 = vld [vmem:[%s5386_s4 + $0xb0] sm:$0xff] }
 0x280   :  { %5420 = vst [vmem:[#allocation4_spill] sm:$0xff] %v4858_v35 }
 0x282   :  { %3962 = vmatpush3.bf16.msra.mxu1 %v3961_v5  ;;  %v4802_v5 = vld [vmem:[%s5386_s4 + $0x70] sm:$0xff] }
 0x285   :  { %1882 = vmatmul.mubr.f32.vlgmr.msra.gmra.mrb[64].mxu1 %v4697_v42 }
 0x286   :  { %3783 = vmatprep.mubr.msk.f32.mxu1 %vm1891_vm2, %v4704_v51 }
 0x358   :  { %v3416_v48 = vpop.f32.mrb[64].mxu1 }
 0x359   :  { %v3417_v52 = vpop.f32.mrb[65].mxu1 }
 0x35a   :  { %v3418_v47 = vadd.f32 %v3417_v52, %v3416_v48  ;;  %v4872_v48 = vld [vmem:[%s5386_s4 + $0xc0] sm:$0xff]  ;;  %v4881_v52 = vld [vmem:[%s5386_s4 + $0xc8] sm:$0xff] }
 0x35b   :  { %5422 = vst [vmem:[#allocation6_spill] sm:$0xff] %v4872_v48  ;;  %5423 = vst [vmem:[#allocation7_spill] sm:$0xff] %v4881_v52 }
 0x35c   :  { %v1887_v49 = vsel %vm171_vm0, %v3418_v47, 0.0  ;;  %v4886_v47 = vld [vmem:[%s5386_s4 + $0xd0] sm:$0xff] }
 0x35d   :  { %1888 = vadd.xlane.f32.xlu0 %v1887_v49  ;;  %5424 = vst [vmem:[#allocation8_spill] sm:$0xff] %v4886_v47  ;;  %v4895_v49 = vld [vmem:[%s5386_s4 + $0xd8] sm:$0xff] }
 0x35e   :  { %5425 = vst [vmem:[#allocation9_spill] sm:$0xff] %v4895_v49 }
 0x3ea   :  { %v1889_v54 = vpop.xlane.xlu0 %1888 }
 0x3eb   :  { %v1890_v60 = vmul.f32 0.00048828125, %v1889_v54  ;;  %v4900_v54 = vld [vmem:[%s5386_s4 + $0xe0] sm:$0xff] }
 0x3ec   :  { %5426 = vst [vmem:[#allocation10_spill] sm:$0xff] %v4900_v54 }
 0x3ed   :  { %3781 = vmatprep.subr.mxu1 %v1890_v60 }
 0x3ee   :  { %3782 = vmatpush3.msra.mxu1 %v1890_v60  ;;  %v4909_v60 = vld [vmem:[%s5386_s4 + $0xe8] sm:$0xff] }
 0x3ef   :  { %3784 = vmatmul.mubr.msk.f32.vlgmr.msra.gmra.mrb[66].mxu1 %vm1891_vm2, %v4713_v7  ;;  %5427 = vst [vmem:[#allocation11_spill] sm:$0xff] %v4909_v60 }
 0x3f0   :  { %3786 = vmatprep.mubr.msk.f32.mxu1 %vm1891_vm2, %v4718_v59 }
 0x3f3   :  { %3787 = vmatmul.mubr.msk.f32.gmra.mrb[68].mxu1 %vm1891_vm2, %v4727_v62 }
 0x3f4   :  { %3789 = vmatprep.mubr.msk.f32.mxu1 %vm1891_vm2, %v4732_v4 }
 0x3f7   :  { %3790 = vmatmul.mubr.msk.f32.gmra.mrb[70].mxu1 %vm1891_vm2, %v4741_v9 }
 0x3f8   :  { %3792 = vmatprep.mubr.msk.f32.mxu1 %vm1891_vm2, %v4746_v21 }
 0x3fb   :  { %3793 = vmatmul.mubr.msk.f32.gmra.mrb[72].mxu1 %vm1891_vm2, %v4755_v31 }
 0x3fc   :  { %3795 = vmatprep.mubr.msk.f32.mxu1 %vm1891_vm2, %v4760_v33 }
 0x3ff   :  { %3796 = vmatmul.mubr.msk.f32.gmra.mrb[74].mxu1 %vm1891_vm2, %v4769_v38 }
 0x400   :  { %3798 = vmatprep.mubr.msk.f32.mxu1 %vm1891_vm2, %v4774_v45 }
 0x403   :  { %3799 = vmatmul.mubr.msk.f32.gmra.mrb[76].mxu1 %vm1891_vm2, %v4783_v50 }
 0x404   :  { %3801 = vmatprep.mubr.msk.f32.mxu1 %vm1891_vm2, %v4788_v57 }
 0x407   :  { %3802 = vmatmul.mubr.msk.f32.gmra.mrb[78].mxu1 %vm1891_vm2, %v4797_v1 }
 0x408   :  { %3804 = vmatprep.mubr.msk.f32.mxu1 %vm1891_vm2, %v4802_v5 }
 0x40b   :  { %3805 = vmatmul.mubr.msk.f32.gmra.mrb[80].mxu1 %vm1891_vm2, %v4811_v14 }
 0x40c   :  { %3807 = vmatprep.mubr.msk.f32.mxu1 %vm1891_vm2, %v4816_v61 }
 0x40f   :  { %3808 = vmatmul.mubr.msk.f32.gmra.mrb[82].mxu1 %vm1891_vm2, %v4825_v2 }
 0x410   :  { %3810 = vmatprep.mubr.msk.f32.mxu1 %vm1891_vm2, %v4830_v11 }
 0x413   :  { %3811 = vmatmul.mubr.msk.f32.gmra.mrb[84].mxu1 %vm1891_vm2, %v4839_v15 }
 0x414   :  { %3813 = vmatprep.mubr.msk.f32.mxu1 %vm1891_vm2, %v4844_v23 }
 0x417   :  { %3814 = vmatmul.mubr.msk.f32.gmra.mrb[86].mxu1 %vm1891_vm2, %v4853_v27 }
 0x418   :  { %3816 = vmatprep.mubr.msk.f32.mxu1 %vm1891_vm2, %v4858_v35 }
 0x41b   :  { %3817 = vmatmul.mubr.msk.f32.gmra.mrb[88].mxu1 %vm1891_vm2, %v4867_v39 }
 0x41c   :  { %3819 = vmatprep.mubr.msk.f32.mxu1 %vm1891_vm2, %v4872_v48 }
 0x41f   :  { %3820 = vmatmul.mubr.msk.f32.gmra.mrb[90].mxu1 %vm1891_vm2, %v4881_v52 }
 0x420   :  { %3822 = vmatprep.mubr.msk.f32.mxu1 %vm1891_vm2, %v4886_v47  ;;  %v4914_v47 = vld [vmem:[%s5386_s4 + $0xf0] sm:$0xff] }
 0x421   :  { %5428 = vst [vmem:[#allocation12_spill] sm:$0xff] %v4914_v47 }
 0x423   :  { %3823 = vmatmul.mubr.msk.f32.gmra.mrb[92].mxu1 %vm1891_vm2, %v4895_v49 }
 0x424   :  { %3825 = vmatprep.mubr.msk.f32.mxu1 %vm1891_vm2, %v4900_v54  ;;  %v4923_v54 = vld [vmem:[%s5386_s4 + $0xf8] sm:$0xff] }
 0x425   :  { %5429 = vst [vmem:[#allocation13_spill] sm:$0xff] %v4923_v54 }
 0x427   :  { %3826 = vmatmul.mubr.msk.f32.gmra.mrb[94].mxu1 %vm1891_vm2, %v4909_v60 }
 0x428   :  { %3828 = vmatprep.mubr.msk.f32.mxu1 %vm1891_vm2, %v4914_v47 }
 0x42b   :  { %3829 = vmatmul.mubr.msk.f32.gmra.mrb[96].mxu1 %vm1891_vm2, %v4923_v54 }
 0x42c   :  { %2341 = vmatprep.mubr.f32.mxu1 %v4595_v20 }
 0x4c2   :  { %v3785_v49 = vpop.f32.mrb[66].mxu1 }
 0x4c3   :  { %v4929_v52 = vsub.f32 %v4606_v34, %v3785_v49  ;;  %v2054_v48 = vpop.f32.mrb[67].mxu1 }
 0x4c4   :  { %v4932_v60 = vsub.f32 %v4600_v29, %v2054_v48 }
 0x4c6   :  { %5430 = vst [vmem:[#allocation14_spill] sm:$0xff] %v4932_v60  ;;  %v3788_v39 = vpop.f32.mrb[68].mxu1 }
 0x4c7   :  { %v4935_v47 = vsub.f32 %v4602_v32, %v3788_v39  ;;  %v2064_v35 = vpop.f32.mrb[69].mxu1 }
 0x4c8   :  { %v4938_v27 = vsub.f32 %v4598_v22, %v2064_v35 }
 0x4ca   :  { %v3791_v23 = vpop.f32.mrb[70].mxu1 }
 0x4cb   :  { %v4941_v54 = vsub.f32 %v4618_v46, %v3791_v23  ;;  %v2074_v20 = vpop.f32.mrb[71].mxu1 }
 0x4cc   :  { %v4944_v34 = vsub.f32 %v4612_v43, %v2074_v20 }
 0x4ce   :  { %v3794_v49 = vpop.f32.mrb[72].mxu1 }
 0x4cf   :  { %v4947_v29 = vsub.f32 %v4614_v44, %v3794_v49  ;;  %v2084_v48 = vpop.f32.mrb[73].mxu1 }
 0x4d0   :  { %v4950_v32 = vsub.f32 %v4610_v41, %v2084_v48 }
 0x4d2   :  { %v3797_v39 = vpop.f32.mrb[74].mxu1 }
 0x4d3   :  { %v4953_v22 = vsub.f32 %v4630_v58, %v3797_v39  ;;  %v2094_v35 = vpop.f32.mrb[75].mxu1 }
 0x4d4   :  { %v4956_v46 = vsub.f32 %v4624_v55, %v2094_v35 }
 0x4d6   :  { %v3800_v23 = vpop.f32.mrb[76].mxu1 }
 0x4d7   :  { %v4959_v43 = vsub.f32 %v4626_v56, %v3800_v23  ;;  %v2104_v20 = vpop.f32.mrb[77].mxu1 }
 0x4d8   :  { %v4962_v44 = vsub.f32 %v4622_v53, %v2104_v20 }
 0x4da   :  { %v3803_v49 = vpop.f32.mrb[78].mxu1 }
 0x4db   :  { %v4965_v41 = vsub.f32 %v4642_v10, %v3803_v49  ;;  %v2114_v48 = vpop.f32.mrb[79].mxu1  ;;  %v2245_v49 = vmul.f32 %v4932_v60, %v4932_v60  ;;  %v2247_v60 = vmul.f32 %v4938_v27, %v4938_v27 }
 0x4dc   :  { %v4968_v58 = vsub.f32 %v4636_v63, %v2114_v48  ;;  %v2246_v63 = vmul.f32 %v4929_v52, %v4929_v52 }
 0x4de   :  { %v3806_v39 = vpop.f32.mrb[80].mxu1 }
 0x4df   :  { %v4971_v55 = vsub.f32 %v4638_v3, %v3806_v39  ;;  %v2124_v35 = vpop.f32.mrb[81].mxu1 }
 0x4e0   :  { %v4974_v56 = vsub.f32 %v4634_v8, %v2124_v35 }
 0x4e2   :  { %v3809_v23 = vpop.f32.mrb[82].mxu1 }
 0x4e3   :  { %v4977_v53 = vsub.f32 %v4654_v0, %v3809_v23  ;;  %v2134_v20 = vpop.f32.mrb[83].mxu1  ;;  %v3965_v23 = vpack.c.bf16 %v2246_v63, %v2245_v49 }
 0x4e4   :  { %v4980_v10 = vsub.f32 %v4648_v19, %v2134_v20  ;;  %v2248_v20 = vmul.f32 %v4935_v47, %v4935_v47 }
 0x4e5   :  { %5431 = vst [vmem:[#allocation15_spill] sm:$0xff] %v4977_v53  ;;  %v2262_v3 = vmul.f32 %v4977_v53, %v4977_v53 }
 0x4e6   :  { %5432 = vst [vmem:[#allocation16_spill] sm:$0xff] %v4980_v10  ;;  %v2261_v8 = vmul.f32 %v4980_v10, %v4980_v10  ;;  %v3812_v48 = vpop.f32.mrb[84].mxu1 }
 0x4e7   :  { %v4991_v0 = vsub.f32 %v4650_v26, %v3812_v48  ;;  %v2144_v39 = vpop.f32.mrb[85].mxu1 }
 0x4e8   :  { %v4994_v19 = vsub.f32 %v4646_v17, %v2144_v39  ;;  %v3963_v35 = vpack.c.bf16 %v2262_v3, %v2261_v8  ;;  %v3969_v3 = vpack.c.bf16 %v2248_v20, %v2247_v60  ;;  %v2250_v8 = vmul.f32 %v4941_v54, %v4941_v54 }
 0x4e9   :  { %v2264_v53 = vmul.f32 %v4991_v0, %v4991_v0  ;;  %v2249_v39 = vmul.f32 %v4944_v34, %v4944_v34  ;;  %v2252_v20 = vmul.f32 %v4947_v29, %v4947_v29 }
 0x4ea   :  { %5433 = vst [vmem:[#allocation17_spill] sm:$0xff] %v4994_v19  ;;  %v2263_v10 = vmul.f32 %v4994_v19, %v4994_v19  ;;  %v3815_v26 = vpop.f32.mrb[86].mxu1  ;;  %3964 = vmatprep.subr.bf16.mxu1 %v3963_v35 }
 0x4eb   :  { %v5005_v48 = vsub.f32 %v4666_v13, %v3815_v26  ;;  %v2154_v17 = vpop.f32.mrb[87].mxu1  ;;  %3966 = vmatpush3.bf16.msra.mxu1 %v3965_v23  ;;  %v2251_v26 = vmul.f32 %v4950_v32, %v4950_v32 }
 0x4ec   :  { %v5008_v63 = vsub.f32 %v4660_v12, %v2154_v17  ;;  %v3967_v49 = vpack.c.bf16 %v2264_v53, %v2263_v10  ;;  %v3973_v10 = vpack.c.bf16 %v2250_v8, %v2249_v39 }
 0x4ed   :  { %v2266_v19 = vmul.f32 %v5005_v48, %v5005_v48  ;;  %v3977_v39 = vpack.c.bf16 %v2252_v20, %v2251_v26 }
 0x4ee   :  { %v2265_v13 = vmul.f32 %v5008_v63, %v5008_v63  ;;  %v3818_v35 = vpop.f32.mrb[88].mxu1  ;;  %3968 = vmatprep.subr.bf16.mxu1 %v3967_v49 }
 0x4ef   :  { %v5019_v23 = vsub.f32 %v4662_v16, %v3818_v35  ;;  %v2164_v12 = vpop.f32.mrb[89].mxu1  ;;  %3970 = vmatpush3.bf16.msra.mxu1 %v3969_v3  ;;  %v2253_v35 = vmul.f32 %v4956_v46, %v4956_v46 }
 0x4f0   :  { %v5022_v60 = vsub.f32 %v4658_v6, %v2164_v12  ;;  %v3971_v53 = vpack.c.bf16 %v2266_v19, %v2265_v13  ;;  %v2254_v13 = vmul.f32 %v4953_v22, %v4953_v22 }
 0x4f1   :  { %v2268_v17 = vmul.f32 %v5019_v23, %v5019_v23 }
 0x4f2   :  { %v2267_v16 = vmul.f32 %v5022_v60, %v5022_v60  ;;  %v3821_v49 = vpop.f32.mrb[90].mxu1  ;;  %3972 = vmatprep.subr.bf16.mxu1 %v3971_v53 }
 0x4f3   :  { %v5033_v3 = vsub.f32 %v4678_v25, %v3821_v49  ;;  %v2174_v6 = vpop.f32.mrb[91].mxu1  ;;  %3974 = vmatpush3.bf16.msra.mxu1 %v3973_v10  ;;  %v2255_v49 = vmul.f32 %v4962_v44, %v4962_v44 }
 0x4f4   :  { %v5036_v19 = vsub.f32 %v4672_v24, %v2174_v6  ;;  %v3975_v8 = vpack.c.bf16 %v2268_v17, %v2267_v16  ;;  %v3981_v17 = vpack.c.bf16 %v2254_v13, %v2253_v35  ;;  %v2256_v16 = vmul.f32 %v4959_v43, %v4959_v43 }
 0x4f5   :  { %v2270_v12 = vmul.f32 %v5033_v3, %v5033_v3 }
 0x4f6   :  { %v2269_v25 = vmul.f32 %v5036_v19, %v5036_v19  ;;  %v3824_v53 = vpop.f32.mrb[92].mxu1  ;;  %3976 = vmatprep.subr.bf16.mxu1 %v3975_v8 }
 0x4f7   :  { %v5047_v10 = vsub.f32 %v4674_v28, %v3824_v53  ;;  %v2184_v24 = vpop.f32.mrb[93].mxu1  ;;  %3978 = vmatpush3.bf16.msra.mxu1 %v3977_v39  ;;  %v2257_v53 = vmul.f32 %v4968_v58, %v4968_v58 }
 0x4f8   :  { %v5050_v20 = vsub.f32 %v4670_v18, %v2184_v24  ;;  %v3979_v26 = vpack.c.bf16 %v2270_v12, %v2269_v25  ;;  %v3985_v12 = vpack.c.bf16 %v2256_v16, %v2255_v49  ;;  %v2258_v25 = vmul.f32 %v4965_v41, %v4965_v41 }
 0x4f9   :  { %v2272_v6 = vmul.f32 %v5047_v10, %v5047_v10 }
 0x4fa   :  { %v2271_v28 = vmul.f32 %v5050_v20, %v5050_v20  ;;  %v3827_v8 = vpop.f32.mrb[94].mxu1  ;;  %3980 = vmatprep.subr.bf16.mxu1 %v3979_v26 }
 0x4fb   :  { %v5061_v39 = vsub.f32 %v4690_v37, %v3827_v8  ;;  %v2194_v18 = vpop.f32.mrb[95].mxu1  ;;  %3982 = vmatpush3.bf16.msra.mxu1 %v3981_v17  ;;  %v2259_v8 = vmul.f32 %v4974_v56, %v4974_v56 }
 0x4fc   :  { %v5064_v13 = vsub.f32 %v4684_v36, %v2194_v18  ;;  %v3983_v35 = vpack.c.bf16 %v2272_v6, %v2271_v28  ;;  %v3989_v6 = vpack.c.bf16 %v2258_v25, %v2257_v53  ;;  %v2260_v28 = vmul.f32 %v4971_v55, %v4971_v55 }
 0x4fd   :  { %v2274_v24 = vmul.f32 %v5061_v39, %v5061_v39 }
 0x4fe   :  { %v2273_v37 = vmul.f32 %v5064_v13, %v5064_v13  ;;  %v3830_v26 = vpop.f32.mrb[96].mxu1  ;;  %3984 = vmatprep.subr.bf16.mxu1 %v3983_v35 }
 0x4ff   :  { %v5075_v17 = vsub.f32 %v4686_v40, %v3830_v26  ;;  %v2204_v36 = vpop.f32.mrb[97].mxu1  ;;  %3986 = vmatpush3.bf16.msra.mxu1 %v3985_v12  ;;  %v3993_v12 = vpack.c.bf16 %v2260_v28, %v2259_v8 }
 0x500   :  { %v5078_v16 = vsub.f32 %v4682_v30, %v2204_v36  ;;  %v3987_v49 = vpack.c.bf16 %v2274_v24, %v2273_v37  ;;  %v4124_v37 = vmov 0  }
 0x501   :  { %v2276_v18 = vmul.f32 %v5075_v17, %v5075_v17  ;;  %4062 = vset.pattern.permute.xlu1 %v4124_v37  ;;  %4063 = vset.pattern.permute.xlu0 %v4124_v37 }
 0x502   :  { %v2275_v40 = vmul.f32 %v5078_v16, %v5078_v16  ;;  %3988 = vmatprep.subr.bf16.mxu1 %v3987_v49 }
 0x503   :  { %3990 = vmatpush3.bf16.msra.mxu1 %v3989_v6 }
 0x504   :  { %v3991_v35 = vpack.c.bf16 %v2276_v18, %v2275_v40 }
 0x506   :  { %3992 = vmatprep.subr.bf16.mxu1 %v3991_v35 }
 0x507   :  { %3994 = vmatpush3.bf16.msra.mxu1 %v3993_v12 }
 0x50a   :  { %2342 = vmatmul.mubr.f32.vlgmr.msra.gmra.mrb[98].mxu1 %v4697_v42  ;;  %v2351_v42 = vld [vmem:[%s5387_s5] sm:$0xff] }
 0x50b   :  { %3833 = vmatprep.mubr.msk.f32.mxu1 %vm1891_vm2, %v4704_v51  ;;  %v2585_v51 = vld [vmem:[%s5388_s6] sm:$0xff] }
 0x5dd   :  { %v3484_v30 = vpop.f32.mrb[98].mxu1 }
 0x5de   :  { %v3485_v25 = vpop.f32.mrb[99].mxu1 }
 0x5df   :  { %v3486_v53 = vadd.f32 %v3485_v25, %v3484_v30 }
 0x5e1   :  { %v2347_v24 = vsel %vm171_vm0, %v3486_v53, 0.0 }
 0x5e2   :  { %2348 = vadd.xlane.f32.xlu0 %v2347_v24 }
 0x66f   :  { %v2349_v26 = vpop.xlane.xlu0 %2348 }
 0x670   :  { %v2350_v36 = vmul.f32 0.00048828125, %v2349_v26 }
 0x672   :  { %v2352_v49 = vadd.f32 1e-05, %v2350_v36 }
 0x674   :  { %4122 = vrsqrt.f32 %v2352_v49 }
 0x67e   :  { %v4123_v6 = vpop.eup %4122 }
 0x67f   :  { %v2354_v28 = vmul.f32 %v4123_v6, %v2351_v42 }
 0x681   :  { %2357 = vperm.xlu1 %4062, %v2354_v28  }
 0x685   :  { %2588 = vperm.xlu1 %4062, %v2585_v51  }
 0x700   :  { %v2358_v8 = vpop.permute.xlu1 %2357 }
 0x701   :  { %3831 = vmatprep.subr.mxu1 %v2358_v8 }
 0x702   :  { %3832 = vmatpush3.msra.mxu1 %v2358_v8 }
 0x703   :  { %3834 = vmatmul.mubr.msk.f32.vlgmr.msra.gmra.mrb[100].mxu1 %vm1891_vm2, %v4713_v7 }
 0x704   :  { %v2589_v18 = vpop.permute.xlu1 %2588  ;;  %3836 = vmatprep.mubr.msk.f32.mxu1 %vm1891_vm2, %v4718_v59 }
 0x705   :  { %3881 = vmatprep.subr.mxu0 %v2589_v18  ;;  %3995 = vmatprep.subr.mxu1 %v2589_v18 }
 0x706   :  { %3882 = vmatpush3.msra.mxu0 %v2589_v18  ;;  %3996 = vmatpush3.msra.mxu1 %v2589_v18 }
 0x707   :  { %3837 = vmatmul.mubr.msk.f32.gmra.mrb[102].mxu1 %vm1891_vm2, %v4727_v62  ;;  %3884 = vmatmul.mubr.msk.f32.vlgmr.msra.gmra.mrb[64].mxu0 %vm1891_vm2, %v4713_v7  ;;  %v5434_v7 = vld [vmem:[#allocation2_spill] sm:$0xff] }
 0x708   :  { %3839 = vmatprep.mubr.msk.f32.mxu1 %vm1891_vm2, %v4732_v4  ;;  %3886 = vmatprep.mubr.msk.f32.mxu0 %vm1891_vm2, %v4718_v59  ;;  %v5435_v59 = vld [vmem:[#allocation3_spill] sm:$0xff] }
 0x70b   :  { %3840 = vmatmul.mubr.msk.f32.gmra.mrb[104].mxu1 %vm1891_vm2, %v4741_v9  ;;  %3887 = vmatmul.mubr.msk.f32.gmra.mrb[66].mxu0 %vm1891_vm2, %v4727_v62  ;;  %v5436_v62 = vld [vmem:[#allocation4_spill] sm:$0xff] }
 0x70c   :  { %3842 = vmatprep.mubr.msk.f32.mxu1 %vm1891_vm2, %v4746_v21  ;;  %3889 = vmatprep.mubr.msk.f32.mxu0 %vm1891_vm2, %v4732_v4  ;;  %v5437_v4 = vld [vmem:[#allocation5_spill] sm:$0xff] }
 0x70f   :  { %3843 = vmatmul.mubr.msk.f32.gmra.mrb[106].mxu1 %vm1891_vm2, %v4755_v31  ;;  %3890 = vmatmul.mubr.msk.f32.gmra.mrb[68].mxu0 %vm1891_vm2, %v4741_v9  ;;  %v5438_v9 = vld [vmem:[#allocation6_spill] sm:$0xff] }
 0x710   :  { %3845 = vmatprep.mubr.msk.f32.mxu1 %vm1891_vm2, %v4760_v33  ;;  %3892 = vmatprep.mubr.msk.f32.mxu0 %vm1891_vm2, %v4746_v21  ;;  %v5439_v21 = vld [vmem:[#allocation7_spill] sm:$0xff] }
 0x713   :  { %3846 = vmatmul.mubr.msk.f32.gmra.mrb[108].mxu1 %vm1891_vm2, %v4769_v38  ;;  %3893 = vmatmul.mubr.msk.f32.gmra.mrb[70].mxu0 %vm1891_vm2, %v4755_v31  ;;  %v5440_v31 = vld [vmem:[#allocation8_spill] sm:$0xff] }
 0x714   :  { %3848 = vmatprep.mubr.msk.f32.mxu1 %vm1891_vm2, %v4774_v45  ;;  %3895 = vmatprep.mubr.msk.f32.mxu0 %vm1891_vm2, %v4760_v33  ;;  %v5441_v33 = vld [vmem:[#allocation9_spill] sm:$0xff] }
 0x717   :  { %3849 = vmatmul.mubr.msk.f32.gmra.mrb[110].mxu1 %vm1891_vm2, %v4783_v50  ;;  %3896 = vmatmul.mubr.msk.f32.gmra.mrb[72].mxu0 %vm1891_vm2, %v4769_v38  ;;  %v5442_v38 = vld [vmem:[#allocation10_spill] sm:$0xff] }
 0x718   :  { %3851 = vmatprep.mubr.msk.f32.mxu1 %vm1891_vm2, %v4788_v57  ;;  %3898 = vmatprep.mubr.msk.f32.mxu0 %vm1891_vm2, %v4774_v45  ;;  %v5443_v45 = vld [vmem:[#allocation11_spill] sm:$0xff] }
 0x71b   :  { %3852 = vmatmul.mubr.msk.f32.gmra.mrb[112].mxu1 %vm1891_vm2, %v4797_v1  ;;  %3899 = vmatmul.mubr.msk.f32.gmra.mrb[74].mxu0 %vm1891_vm2, %v4783_v50  ;;  %v5444_v50 = vld [vmem:[#allocation12_spill] sm:$0xff] }
 0x71c   :  { %3854 = vmatprep.mubr.msk.f32.mxu1 %vm1891_vm2, %v4802_v5  ;;  %3901 = vmatprep.mubr.msk.f32.mxu0 %vm1891_vm2, %v4788_v57  ;;  %v5445_v57 = vld [vmem:[#allocation13_spill] sm:$0xff] }
 0x71f   :  { %3855 = vmatmul.mubr.msk.f32.gmra.mrb[114].mxu1 %vm1891_vm2, %v4811_v14  ;;  %3902 = vmatmul.mubr.msk.f32.gmra.mrb[76].mxu0 %vm1891_vm2, %v4797_v1 }
 0x720   :  { %3857 = vmatprep.mubr.msk.f32.mxu1 %vm1891_vm2, %v4816_v61  ;;  %3904 = vmatprep.mubr.msk.f32.mxu0 %vm1891_vm2, %v4802_v5 }
 0x723   :  { %3858 = vmatmul.mubr.msk.f32.gmra.mrb[116].mxu1 %vm1891_vm2, %v4825_v2  ;;  %3905 = vmatmul.mubr.msk.f32.gmra.mrb[78].mxu0 %vm1891_vm2, %v4811_v14 }
 0x724   :  { %3860 = vmatprep.mubr.msk.f32.mxu1 %vm1891_vm2, %v4830_v11  ;;  %3907 = vmatprep.mubr.msk.f32.mxu0 %vm1891_vm2, %v4816_v61  ;;  %v5446_v61 = vld [vmem:[#allocation14_spill] sm:$0xff] }
 0x727   :  { %3861 = vmatmul.mubr.msk.f32.gmra.mrb[118].mxu1 %vm1891_vm2, %v4839_v15  ;;  %3908 = vmatmul.mubr.msk.f32.gmra.mrb[80].mxu0 %vm1891_vm2, %v4825_v2 }
 0x728   :  { %3863 = vmatprep.mubr.msk.f32.mxu1 %vm1891_vm2, %v5434_v7 }
 0x72b   :  { %3864 = vmatmul.mubr.msk.f32.gmra.mrb[120].mxu1 %vm1891_vm2, %v5435_v59 }
 0x72c   :  { %3866 = vmatprep.mubr.msk.f32.mxu1 %vm1891_vm2, %v5436_v62 }
 0x72f   :  { %3867 = vmatmul.mubr.msk.f32.gmra.mrb[122].mxu1 %vm1891_vm2, %v5437_v4 }
 0x730   :  { %3869 = vmatprep.mubr.msk.f32.mxu1 %vm1891_vm2, %v5438_v9 }
 0x733   :  { %3870 = vmatmul.mubr.msk.f32.gmra.mrb[124].mxu1 %vm1891_vm2, %v5439_v21 }
 0x734   :  { %3872 = vmatprep.mubr.msk.f32.mxu1 %vm1891_vm2, %v5440_v31 }
 0x737   :  { %3873 = vmatmul.mubr.msk.f32.gmra.mrb[126].mxu1 %vm1891_vm2, %v5441_v33 }
 0x738   :  { %3875 = vmatprep.mubr.msk.f32.mxu1 %vm1891_vm2, %v5442_v38 }
 0x73b   :  { %3876 = vmatmul.mubr.msk.f32.gmra.mrb[128].mxu1 %vm1891_vm2, %v5443_v45 }
 0x73c   :  { %3878 = vmatprep.mubr.msk.f32.mxu1 %vm1891_vm2, %v5444_v50 }
 0x73f   :  { %3879 = vmatmul.mubr.msk.f32.gmra.mrb[130].mxu1 %vm1891_vm2, %v5445_v57 }
 0x740   :  { %3910 = vmatprep.mubr.msk.f32.mxu1 %vm1891_vm2, %v4830_v11 }
 0x743   :  { %3911 = vmatmul.mubr.msk.f32.vlgmr.msra.gmra.mrb[132].mxu1 %vm1891_vm2, %v4839_v15 }
 0x744   :  { %3913 = vmatprep.mubr.msk.f32.mxu1 %vm1891_vm2, %v5434_v7 }
 0x747   :  { %3914 = vmatmul.mubr.msk.f32.gmra.mrb[134].mxu1 %vm1891_vm2, %v5435_v59 }
 0x748   :  { %3916 = vmatprep.mubr.msk.f32.mxu1 %vm1891_vm2, %v5436_v62 }
 0x74b   :  { %3917 = vmatmul.mubr.msk.f32.gmra.mrb[136].mxu1 %vm1891_vm2, %v5437_v4 }
 0x74c   :  { %3919 = vmatprep.mubr.msk.f32.mxu1 %vm1891_vm2, %v5438_v9 }
 0x74f   :  { %3920 = vmatmul.mubr.msk.f32.gmra.mrb[138].mxu1 %vm1891_vm2, %v5439_v21 }
 0x750   :  { %3922 = vmatprep.mubr.msk.f32.mxu1 %vm1891_vm2, %v5440_v31 }
 0x753   :  { %3923 = vmatmul.mubr.msk.f32.gmra.mrb[140].mxu1 %vm1891_vm2, %v5441_v33 }
 0x754   :  { %3925 = vmatprep.mubr.msk.f32.mxu1 %vm1891_vm2, %v5442_v38 }
 0x757   :  { %3926 = vmatmul.mubr.msk.f32.gmra.mrb[142].mxu1 %vm1891_vm2, %v5443_v45 }
 0x758   :  { %3928 = vmatprep.mubr.msk.f32.mxu1 %vm1891_vm2, %v5444_v50 }
 0x75b   :  { %3929 = vmatmul.mubr.msk.f32.gmra.mrb[144].mxu1 %vm1891_vm2, %v5445_v57 }
 0x7d6   :  { %v3835_v1 = vpop.f32.mrb[100].mxu1 }
 0x7d7   :  { %v2426_v5 = vpop.f32.mrb[101].mxu1  ;;  %v2817_v14 = vmul.f32 %v3835_v1, %v4929_v52 }
 0x7d8   :  { %v2816_v2 = vmul.f32 %v2426_v5, %v5446_v61 }
 0x7da   :  { %v3838_v11 = vpop.f32.mrb[102].mxu1  ;;  %v3885_v15 = vpop.f32.mrb[64].mxu0 }
 0x7db   :  { %v2849_v40 = vadd.f32 %v3885_v15, %v2817_v14  ;;  %v2436_v35 = vpop.f32.mrb[103].mxu1  ;;  %v2657_v12 = vpop.f32.mrb[65].mxu0  ;;  %v2819_v25 = vmul.f32 %v3838_v11, %v4935_v47 }
 0x7dc   :  { %v2848_v30 = vadd.f32 %v2816_v2, %v2657_v12  ;;  %v2818_v24 = vmul.f32 %v2436_v35, %v4938_v27 }
 0x7dd   :  { %v2881_v53 = vmax.f32 %v2849_v40, 0.0 }
 0x7de   :  { %v2880_v37 = vmax.f32 %v2848_v30, 0.0  ;;  %v3841_v26 = vpop.f32.mrb[104].mxu1  ;;  %v3888_v36 = vpop.f32.mrb[66].mxu0 }
 0x7df   :  { %2913 = vst.msk [vmem:[%s5389_s7 + $0x8] sm:$0xff] %vm171_vm0, %v2881_v53  ;;  %v2851_v52 = vadd.f32 %v3888_v36, %v2819_v25  ;;  %v2446_v49 = vpop.f32.mrb[105].mxu1  ;;  %v2667_v42 = vpop.f32.mrb[67].mxu0  ;;  %v2821_v6 = vmul.f32 %v3841_v26, %v4941_v54 }
 0x7e0   :  { %2912 = vst.msk [vmem:[%s5389_s7] sm:$0xff] %vm171_vm0, %v2880_v37  ;;  %v2850_v47 = vadd.f32 %v2818_v24, %v2667_v42  ;;  %v2820_v28 = vmul.f32 %v2446_v49, %v4944_v34 }
 0x7e1   :  { %v2883_v27 = vmax.f32 %v2851_v52, 0.0 }
 0x7e2   :  { %v2882_v51 = vmax.f32 %v2850_v47, 0.0  ;;  %v3844_v8 = vpop.f32.mrb[106].mxu1  ;;  %v3891_v18 = vpop.f32.mrb[68].mxu0 }
 0x7e3   :  { %2915 = vst.msk [vmem:[%s5389_s7 + $0x18] sm:$0xff] %vm171_vm0, %v2883_v27  ;;  %v2853_v7 = vadd.f32 %v3891_v18, %v2821_v6  ;;  %v2456_v59 = vpop.f32.mrb[107].mxu1  ;;  %v2677_v62 = vpop.f32.mrb[69].mxu0  ;;  %v2823_v4 = vmul.f32 %v3844_v8, %v4947_v29 }
 0x7e4   :  { %2914 = vst.msk [vmem:[%s5389_s7 + $0x10] sm:$0xff] %vm171_vm0, %v2882_v51  ;;  %v2852_v54 = vadd.f32 %v2820_v28, %v2677_v62  ;;  %v2822_v9 = vmul.f32 %v2456_v59, %v4950_v32 }
 0x7e5   :  { %v2885_v34 = vmax.f32 %v2853_v7, 0.0 }
 0x7e6   :  { %v2884_v21 = vmax.f32 %v2852_v54, 0.0  ;;  %v3847_v31 = vpop.f32.mrb[108].mxu1  ;;  %v3894_v33 = vpop.f32.mrb[70].mxu0 }
 0x7e7   :  { %2917 = vst.msk [vmem:[%s5389_s7 + $0x28] sm:$0xff] %vm171_vm0, %v2885_v34  ;;  %v2855_v38 = vadd.f32 %v3894_v33, %v2823_v4  ;;  %v2466_v45 = vpop.f32.mrb[109].mxu1  ;;  %v2687_v50 = vpop.f32.mrb[71].mxu0  ;;  %v2825_v57 = vmul.f32 %v3847_v31, %v4953_v22  ;;  %v5447_v4 = vld [vmem:[#allocation15_spill] sm:$0xff] }
 0x7e8   :  { %2916 = vst.msk [vmem:[%s5389_s7 + $0x20] sm:$0xff] %vm171_vm0, %v2884_v21  ;;  %v2854_v29 = vadd.f32 %v2822_v9, %v2687_v50  ;;  %v2824_v1 = vmul.f32 %v2466_v45, %v4956_v46  ;;  %v5448_v9 = vld [vmem:[#allocation16_spill] sm:$0xff] }
 0x7e9   :  { %v2887_v32 = vmax.f32 %v2855_v38, 0.0 }
 0x7ea   :  { %v2886_v5 = vmax.f32 %v2854_v29, 0.0  ;;  %v3850_v14 = vpop.f32.mrb[110].mxu1  ;;  %v3897_v61 = vpop.f32.mrb[72].mxu0 }
 0x7eb   :  { %2919 = vst.msk [vmem:[%s5389_s7 + $0x38] sm:$0xff] %vm171_vm0, %v2887_v32  ;;  %v2857_v2 = vadd.f32 %v3897_v61, %v2825_v57  ;;  %v2476_v11 = vpop.f32.mrb[111].mxu1  ;;  %v2697_v15 = vpop.f32.mrb[73].mxu0  ;;  %v2827_v40 = vmul.f32 %v3850_v14, %v4959_v43 }
 0x7ec   :  { %2918 = vst.msk [vmem:[%s5389_s7 + $0x30] sm:$0xff] %vm171_vm0, %v2886_v5  ;;  %v2856_v22 = vadd.f32 %v2824_v1, %v2697_v15  ;;  %v2826_v35 = vmul.f32 %v2476_v11, %v4962_v44 }
 0x7ed   :  { %v2889_v46 = vmax.f32 %v2857_v2, 0.0 }
 0x7ee   :  { %v2888_v12 = vmax.f32 %v2856_v22, 0.0  ;;  %v3853_v30 = vpop.f32.mrb[112].mxu1  ;;  %v3900_v25 = vpop.f32.mrb[74].mxu0 }
 0x7ef   :  { %2921 = vst.msk [vmem:[%s5389_s7 + $0x48] sm:$0xff] %vm171_vm0, %v2889_v46  ;;  %v2859_v53 = vadd.f32 %v3900_v25, %v2827_v40  ;;  %v2486_v24 = vpop.f32.mrb[113].mxu1  ;;  %v2707_v37 = vpop.f32.mrb[75].mxu0  ;;  %v2829_v26 = vmul.f32 %v3853_v30, %v4965_v41 }
 0x7f0   :  { %2920 = vst.msk [vmem:[%s5389_s7 + $0x40] sm:$0xff] %vm171_vm0, %v2888_v12  ;;  %v2858_v43 = vadd.f32 %v2826_v35, %v2707_v37  ;;  %v2828_v36 = vmul.f32 %v2486_v24, %v4968_v58 }
 0x7f1   :  { %v2891_v44 = vmax.f32 %v2859_v53, 0.0  ;;  %v5449_v53 = vld [vmem:[#allocation17_spill] sm:$0xff] }
 0x7f2   :  { %v2890_v52 = vmax.f32 %v2858_v43, 0.0  ;;  %v3856_v49 = vpop.f32.mrb[114].mxu1  ;;  %v3903_v42 = vpop.f32.mrb[76].mxu0 }
 0x7f3   :  { %2923 = vst.msk [vmem:[%s5389_s7 + $0x58] sm:$0xff] %vm171_vm0, %v2891_v44  ;;  %v2861_v47 = vadd.f32 %v3903_v42, %v2829_v26  ;;  %v2496_v6 = vpop.f32.mrb[115].mxu1  ;;  %v2717_v27 = vpop.f32.mrb[77].mxu0  ;;  %v2831_v28 = vmul.f32 %v3856_v49, %v4971_v55 }
 0x7f4   :  { %2922 = vst.msk [vmem:[%s5389_s7 + $0x50] sm:$0xff] %vm171_vm0, %v2890_v52  ;;  %v2860_v41 = vadd.f32 %v2828_v36, %v2717_v27  ;;  %v2830_v51 = vmul.f32 %v2496_v6, %v4974_v56 }
 0x7f5   :  { %v2893_v58 = vmax.f32 %v2861_v47, 0.0 }
 0x7f6   :  { %v2892_v8 = vmax.f32 %v2860_v41, 0.0  ;;  %v3859_v18 = vpop.f32.mrb[116].mxu1  ;;  %v3906_v7 = vpop.f32.mrb[78].mxu0 }
 0x7f7   :  { %2925 = vst.msk [vmem:[%s5389_s7 + $0x68] sm:$0xff] %vm171_vm0, %v2893_v58  ;;  %v2863_v59 = vadd.f32 %v3906_v7, %v2831_v28  ;;  %v2506_v62 = vpop.f32.mrb[117].mxu1  ;;  %v2727_v54 = vpop.f32.mrb[79].mxu0  ;;  %v2833_v34 = vmul.f32 %v3859_v18, %v5447_v4 }
 0x7f8   :  { %2924 = vst.msk [vmem:[%s5389_s7 + $0x60] sm:$0xff] %vm171_vm0, %v2892_v8  ;;  %v2862_v55 = vadd.f32 %v2830_v51, %v2727_v54  ;;  %v2832_v21 = vmul.f32 %v2506_v62, %v5448_v9 }
 0x7f9   :  { %v2895_v56 = vmax.f32 %v2863_v59, 0.0 }
 0x7fa   :  { %v2894_v31 = vmax.f32 %v2862_v55, 0.0  ;;  %v3862_v33 = vpop.f32.mrb[118].mxu1  ;;  %v3909_v38 = vpop.f32.mrb[80].mxu0 }
 0x7fb   :  { %2927 = vst.msk [vmem:[%s5389_s7 + $0x78] sm:$0xff] %vm171_vm0, %v2895_v56  ;;  %v2865_v45 = vadd.f32 %v3909_v38, %v2833_v34  ;;  %v2516_v50 = vpop.f32.mrb[119].mxu1  ;;  %v2737_v29 = vpop.f32.mrb[81].mxu0  ;;  %v2835_v25 = vmul.f32 %v3862_v33, %v4991_v0 }
 0x7fc   :  { %2926 = vst.msk [vmem:[%s5389_s7 + $0x70] sm:$0xff] %vm171_vm0, %v2894_v31  ;;  %v2864_v57 = vadd.f32 %v2832_v21, %v2737_v29  ;;  %v2834_v24 = vmul.f32 %v2516_v50, %v5449_v53 }
 0x7fd   :  { %v2897_v32 = vmax.f32 %v2865_v45, 0.0 }
 0x7fe   :  { %v2896_v1 = vmax.f32 %v2864_v57, 0.0  ;;  %v3865_v5 = vpop.f32.mrb[120].mxu1 }
 0x7ff   :  { %2929 = vst.msk [vmem:[%s5389_s7 + $0x88] sm:$0xff] %vm171_vm0, %v2897_v32  ;;  %v2526_v14 = vpop.f32.mrb[121].mxu1  ;;  %v2837_v36 = vmul.f32 %v3865_v5, %v5005_v48 }
 0x800   :  { %2928 = vst.msk [vmem:[%s5389_s7 + $0x80] sm:$0xff] %vm171_vm0, %v2896_v1  ;;  %v2836_v49 = vmul.f32 %v2526_v14, %v5008_v63 }
 0x802   :  { %v3868_v61 = vpop.f32.mrb[122].mxu1 }
 0x803   :  { %v2536_v2 = vpop.f32.mrb[123].mxu1  ;;  %v2839_v48 = vmul.f32 %v3868_v61, %v5019_v23 }
 0x804   :  { %v2838_v63 = vmul.f32 %v2536_v2, %v5022_v60 }
 0x806   :  { %v3871_v11 = vpop.f32.mrb[124].mxu1 }
 0x807   :  { %v2546_v15 = vpop.f32.mrb[125].mxu1  ;;  %v2841_v23 = vmul.f32 %v3871_v11, %v5033_v3 }
 0x808   :  { %v2840_v60 = vmul.f32 %v2546_v15, %v5036_v19 }
 0x80a   :  { %v3874_v22 = vpop.f32.mrb[126].mxu1 }
 0x80b   :  { %v2556_v40 = vpop.f32.mrb[127].mxu1  ;;  %v2843_v3 = vmul.f32 %v3874_v22, %v5047_v10 }
 0x80c   :  { %v2842_v19 = vmul.f32 %v2556_v40, %v5050_v20 }
 0x80e   :  { %v3877_v46 = vpop.f32.mrb[128].mxu1 }
 0x80f   :  { %v2566_v35 = vpop.f32.mrb[129].mxu1  ;;  %v2845_v10 = vmul.f32 %v3877_v46, %v5061_v39 }
 0x810   :  { %v2844_v20 = vmul.f32 %v2566_v35, %v5064_v13 }
 0x812   :  { %v3880_v12 = vpop.f32.mrb[130].mxu1 }
 0x813   :  { %v2576_v30 = vpop.f32.mrb[131].mxu1  ;;  %v2847_v39 = vmul.f32 %v3880_v12, %v5075_v17 }
 0x814   :  { %v2846_v13 = vmul.f32 %v2576_v30, %v5078_v16 }
 0x816   :  { %v3912_v37 = vpop.f32.mrb[132].mxu1 }
 0x817   :  { %v2867_v43 = vadd.f32 %v3912_v37, %v2835_v25  ;;  %v2747_v26 = vpop.f32.mrb[133].mxu1 }
 0x818   :  { %v2866_v44 = vadd.f32 %v2834_v24, %v2747_v26 }
 0x819   :  { %v2899_v52 = vmax.f32 %v2867_v43, 0.0 }
 0x81a   :  { %v2898_v42 = vmax.f32 %v2866_v44, 0.0  ;;  %v3915_v47 = vpop.f32.mrb[134].mxu1 }
 0x81b   :  { %2931 = vst.msk [vmem:[%s5389_s7 + $0x98] sm:$0xff] %vm171_vm0, %v2899_v52  ;;  %v2869_v6 = vadd.f32 %v3915_v47, %v2837_v36  ;;  %v2757_v0 = vpop.f32.mrb[135].mxu1 }
 0x81c   :  { %2930 = vst.msk [vmem:[%s5389_s7 + $0x90] sm:$0xff] %vm171_vm0, %v2898_v42  ;;  %v2868_v27 = vadd.f32 %v2836_v49, %v2757_v0 }
 0x81d   :  { %v2901_v41 = vmax.f32 %v2869_v6, 0.0 }
 0x81e   :  { %v2900_v28 = vmax.f32 %v2868_v27, 0.0  ;;  %v3918_v58 = vpop.f32.mrb[136].mxu1 }
 0x81f   :  { %2933 = vst.msk [vmem:[%s5389_s7 + $0xa8] sm:$0xff] %vm171_vm0, %v2901_v41  ;;  %v2871_v51 = vadd.f32 %v3918_v58, %v2839_v48  ;;  %v2767_v8 = vpop.f32.mrb[137].mxu1 }
 0x820   :  { %2932 = vst.msk [vmem:[%s5389_s7 + $0xa0] sm:$0xff] %vm171_vm0, %v2900_v28  ;;  %v2870_v18 = vadd.f32 %v2838_v63, %v2767_v8 }
 0x821   :  { %v2903_v7 = vmax.f32 %v2871_v51, 0.0 }
 0x822   :  { %v2902_v59 = vmax.f32 %v2870_v18, 0.0  ;;  %v3921_v62 = vpop.f32.mrb[138].mxu1 }
 0x823   :  { %2935 = vst.msk [vmem:[%s5389_s7 + $0xb8] sm:$0xff] %vm171_vm0, %v2903_v7  ;;  %v2873_v54 = vadd.f32 %v3921_v62, %v2841_v23  ;;  %v2777_v55 = vpop.f32.mrb[139].mxu1 }
 0x824   :  { %2934 = vst.msk [vmem:[%s5389_s7 + $0xb0] sm:$0xff] %vm171_vm0, %v2902_v59  ;;  %v2872_v4 = vadd.f32 %v2840_v60, %v2777_v55 }
 0x825   :  { %v2905_v34 = vmax.f32 %v2873_v54, 0.0 }
 0x826   :  { %v2904_v56 = vmax.f32 %v2872_v4, 0.0  ;;  %v3924_v9 = vpop.f32.mrb[140].mxu1 }
 0x827   :  { %2937 = vst.msk [vmem:[%s5389_s7 + $0xc8] sm:$0xff] %vm171_vm0, %v2905_v34  ;;  %v2875_v21 = vadd.f32 %v3924_v9, %v2843_v3  ;;  %v2787_v31 = vpop.f32.mrb[141].mxu1 }
 0x828   :  { %2936 = vst.msk [vmem:[%s5389_s7 + $0xc0] sm:$0xff] %vm171_vm0, %v2904_v56  ;;  %v2874_v33 = vadd.f32 %v2842_v19, %v2787_v31 }
 0x829   :  { %v2907_v38 = vmax.f32 %v2875_v21, 0.0 }
 0x82a   :  { %v2906_v45 = vmax.f32 %v2874_v33, 0.0  ;;  %v3927_v50 = vpop.f32.mrb[142].mxu1 }
 0x82b   :  { %2939 = vst.msk [vmem:[%s5389_s7 + $0xd8] sm:$0xff] %vm171_vm0, %v2907_v38  ;;  %v2877_v29 = vadd.f32 %v3927_v50, %v2845_v10  ;;  %v2797_v57 = vpop.f32.mrb[143].mxu1 }
 0x82c   :  { %2938 = vst.msk [vmem:[%s5389_s7 + $0xd0] sm:$0xff] %vm171_vm0, %v2906_v45  ;;  %v2876_v32 = vadd.f32 %v2844_v20, %v2797_v57 }
 0x82d   :  { %v2909_v1 = vmax.f32 %v2877_v29, 0.0 }
 0x82e   :  { %v2908_v5 = vmax.f32 %v2876_v32, 0.0  ;;  %v3930_v14 = vpop.f32.mrb[144].mxu1 }
 0x82f   :  { %2941 = vst.msk [vmem:[%s5389_s7 + $0xe8] sm:$0xff] %vm171_vm0, %v2909_v1  ;;  %v2879_v61 = vadd.f32 %v3930_v14, %v2847_v39  ;;  %v2807_v2 = vpop.f32.mrb[145].mxu1 }
 0x830   :  { %2940 = vst.msk [vmem:[%s5389_s7 + $0xe0] sm:$0xff] %vm171_vm0, %v2908_v5  ;;  %v2878_v11 = vadd.f32 %v2846_v13, %v2807_v2 }
 0x831   :  { %v2911_v15 = vmax.f32 %v2879_v61, 0.0 }
 0x832   :  { %v2910_v17 = vmax.f32 %v2878_v11, 0.0 }
 0x833   :  { %2943 = vst.msk [vmem:[%s5389_s7 + $0xf8] sm:$0xff] %vm171_vm0, %v2911_v15 }
 0x834   :  { %2942 = vst.msk [vmem:[%s5389_s7 + $0xf0] sm:$0xff] %vm171_vm0, %v2910_v17 }

</bundles_post_ra>
